<compile_context>
chip_gen: v6e
topology: v6e:2x2x1
jax: 0.10.0
libtpu: 0.0.40
codegen_flags: <defaults>
</compile_context>

<pallas_src>
import functools

import jax
import jax.numpy as jnp
from jax import lax
from jax.experimental import pallas as pl
from jax.experimental.pallas import tpu as pltpu

DROP_P = 0.1
QK_SCALE = 1.0 / 10.0


def _attn_dropout_kernel(x1_ref, x2_ref, x3_ref, u_ref, o_ref, *, use_approx_recip):
    # Per grid step:
    #   x1_ref: (M, D)      queries (shared across batch)
    #   x2_ref: (Bt, N, D)  batch tile of keys
    #   x3_ref: (N, E)      value matrix (shared)
    #   u_ref : (Bt, M, N)  dropout uniforms
    #   o_ref : (Bt, M, E)
    q = x1_ref[...] * QK_SCALE           # fold qk/10 into the tiny (M, D) operand
    k = x2_ref[...]
    v = x3_ref[...]

    bt, n, d = k.shape
    m_rows = q.shape[0]
    e_cols = v.shape[1]

    # qk[b] = x1 @ x2[b]^T : contract the last dim of both operands directly so the
    # MXU consumes k row-major (no explicit k.T / XLU transpose).
    qb = jnp.broadcast_to(q[None], (bt, m_rows, d))
    s = lax.dot_general(
        qb, k, (((2,), (2,)), ((0,), (0,))),
        preferred_element_type=jnp.float32)                      # (Bt, M, N)

    # numerically stable softmax over the last axis
    s_max = jnp.max(s, axis=-1, keepdims=True)
    e = jnp.exp(s - s_max)
    denom = jnp.sum(e, axis=-1, keepdims=True)                   # (Bt, M, 1)

    # Fold softmax normalization and the dropout keep-scale into one coefficient.
    if use_approx_recip:
        inv = pl.reciprocal(denom, approx=True)                  # EUP slot on TPU
    else:
        inv = 1.0 / denom                                        # safe under interpret
    coef = inv * (1.0 / (1.0 - DROP_P))

    # dropout(p=0.1), training semantics (keep w.p. 0.9, scale kept by 1/0.9)
    keep = u_ref[...] >= DROP_P                                  # (Bt, M, N)
    p = jnp.where(keep, e * coef, 0.0)

    # (dropout_qk) @ x3, batched over the tile
    vb = jnp.broadcast_to(v[None], (bt, n, e_cols))
    o_ref[...] = lax.dot_general(
        p, vb, (((2,), (1,)), ((0,), (0,))),
        preferred_element_type=jnp.float32)                      # (Bt, M, E)


def model_forward(x1, x2, x3, dropout_u, *, batch_tile=None):
    m, d = x1.shape
    b, n, d2 = x2.shape
    n2, e = x3.shape
    assert d == d2 and n == n2 and dropout_u.shape == (b, m, n)

    # Toy batch: process the whole batch in a single grid step. For larger B pass
    # batch_tile < B; the batch axis is "parallel" so v7x's 2 TCs split it.
    bt = b if batch_tile is None else batch_tile
    assert b % bt == 0
    grid = (b // bt,)

    use_approx_recip = jax.default_backend() == "tpu"

    cost = pl.CostEstimate(
        flops=2 * b * m * n * (d + e),
        transcendentals=b * m * n,
        bytes_accessed=4 * (m * d + b * n * d + n * e + b * m * n + b * m * e),
    )

    kernel = functools.partial(_attn_dropout_kernel,
                               use_approx_recip=use_approx_recip)

    return pl.pallas_call(
        kernel,
        out_shape=jax.ShapeDtypeStruct((b, m, e), jnp.float32),
        grid=grid,
        in_specs=[
            pl.BlockSpec((m, d), lambda i: (0, 0)),           # x1, shared
            pl.BlockSpec((bt, n, d), lambda i: (i, 0, 0)),    # x2 batch tile
            pl.BlockSpec((n, e), lambda i: (0, 0)),           # x3, shared
            pl.BlockSpec((bt, m, n), lambda i: (i, 0, 0)),    # dropout uniforms
        ],
        out_specs=pl.BlockSpec((bt, m, e), lambda i: (i, 0, 0)),
        compiler_params=pltpu.CompilerParams(
            dimension_semantics=("parallel",)),
        cost_estimate=cost,
    )(x1, x2, x3, dropout_u)


def _reference(x1, x2, x3, u):
    qk = jnp.einsum("md,bnd->bmn", x1, x2) / 10.0
    sm = jax.nn.softmax(qk, axis=-1)
    dropped = jnp.where(u >= DROP_P, sm * (1.0 / (1.0 - DROP_P)), 0.0)
    return jnp.einsum("bmn,ne->bme", dropped, x3)


if __name__ == "__main__":
    key = jax.random.PRNGKey(0)
    k1, k2, k3, kd = jax.random.split(key, 4)

    # Shapes implied by the forward pass: the module's x1=(4,4), x3=(512,8);
    # x2 is taken as (B, N, D) = (4, 512, 4) so that matmul(x1, x2.transpose(-2,-1))
    # and the final matmul with x3 are shape-consistent.
    B, M, N, D, E = 4, 4, 512, 4, 8
    x1 = jax.random.normal(k1, (M, D), dtype=jnp.float32)
    x2 = jax.random.normal(k2, (B, N, D), dtype=jnp.float32)
    x3 = jax.random.normal(k3, (N, E), dtype=jnp.float32)
    # Dropout randomness is generated outside the kernel: TPU in-kernel PRNG
    # primitives (pltpu.prng_seed / prng_random_bits) have no CPU/interpret lowering.
    u = jax.random.uniform(kd, (B, M, N), dtype=jnp.float32)

    out = model_forward(x1, x2, x3, u)
    jax.block_until_ready(out)
    assert out.shape == (B, M, E)

    ref = _reference(x1, x2, x3, u)
    assert jnp.allclose(out, ref, rtol=8e-2, atol=2e-3), \
        "kernel output does not match reference"
    print("KERNEL_OK")
</pallas_src>

<mosaic_0001>
module attributes {stable_mosaic.version = 11 : i64} {
  func.func @_attn_dropout_kernel(%arg0: i32, %arg1: memref<4x4xf32, #tpu.memory_space<vmem>>, %arg2: memref<4x512x4xf32, #tpu.memory_space<vmem>>, %arg3: memref<512x8xf32, #tpu.memory_space<vmem>>, %arg4: memref<4x4x512xf32, #tpu.memory_space<vmem>>, %arg5: memref<4x4x8xf32, #tpu.memory_space<vmem>>) attributes {dimension_semantics = [#tpu.dimension_semantics<parallel>], iteration_bounds = array<i64: 1>, scalar_prefetch = 0 : i64, scratch_operands = 0 : i64, tpu.core_type = #tpu.core_type<tc>, window_params = [{pipeline_mode = #tpu.pipeline_mode<synchronous>, transform_indices = @transform_0, window_bounds = array<i64: 4, 4>}, {transform_indices = @transform_1, window_bounds = array<i64: 4, 512, 4>}, {pipeline_mode = #tpu.pipeline_mode<synchronous>, transform_indices = @transform_2, window_bounds = array<i64: 512, 8>}, {transform_indices = @transform_3, window_bounds = array<i64: 4, 4, 512>}, {transform_indices = @transform_4, window_bounds = array<i64: 4, 4, 8>}]} {
    %c0 = arith.constant 0 : index
    %c0_0 = arith.constant 0 : index
    %0 = vector.load %arg1[%c0, %c0_0] : memref<4x4xf32, #tpu.memory_space<vmem>>, vector<4x4xf32>
    %cst = arith.constant 1.000000e-01 : f32
    %1 = vector.broadcast %cst : f32 to vector<4x4xf32>
    %2 = arith.mulf %0, %1 : vector<4x4xf32>
    %c0_1 = arith.constant 0 : index
    %c0_2 = arith.constant 0 : index
    %c0_3 = arith.constant 0 : index
    %3 = vector.load %arg2[%c0_1, %c0_2, %c0_3] : memref<4x512x4xf32, #tpu.memory_space<vmem>>, vector<4x512x4xf32>
    %c0_4 = arith.constant 0 : index
    %c0_5 = arith.constant 0 : index
    %4 = vector.load %arg3[%c0_4, %c0_5] : memref<512x8xf32, #tpu.memory_space<vmem>>, vector<512x8xf32>
    %5 = vector.shape_cast %2 : vector<4x4xf32> to vector<1x4x4xf32>
    %6 = vector.shape_cast %5 : vector<1x4x4xf32> to vector<1x4x4xf32>
    %7 = vector.broadcast %6 : vector<1x4x4xf32> to vector<4x4x4xf32>
    %cst_6 = arith.constant dense<0.000000e+00> : vector<4x4x512xf32>
    %8 = tpu.matmul %7, %3, %cst_6 {dimension_numbers = #tpu.dot_dimension_numbers<[2], [2], [1], [1], [0, 0, 0, 1, 1, 1], [0], [0]>} : vector<4x4x4xf32>, vector<4x512x4xf32>, vector<4x4x512xf32> -> vector<4x4x512xf32>
    %cst_7 = arith.constant dense<0xFF800000> : vector<4x4xf32>
    %9 = vector.multi_reduction <maximumf>, %8, %cst_7 [2] : vector<4x4x512xf32> to vector<4x4xf32>
    %10 = vector.shape_cast %9 : vector<4x4xf32> to vector<4x4x1xf32>
    %11 = vector.broadcast %10 : vector<4x4x1xf32> to vector<4x4x512xf32>
    %12 = arith.subf %8, %11 : vector<4x4x512xf32>
    %13 = math.exp %12 : vector<4x4x512xf32>
    %cst_8 = arith.constant dense<0.000000e+00> : vector<4x4xf32>
    %14 = vector.multi_reduction <add>, %13, %cst_8 [2] : vector<4x4x512xf32> to vector<4x4xf32>
    %15 = vector.shape_cast %14 : vector<4x4xf32> to vector<4x4x1xf32>
    %cst_9 = arith.constant 1.000000e+00 : f32
    %16 = vector.broadcast %cst_9 : f32 to vector<4x4x1xf32>
    %17 = arith.divf %16, %15 : vector<4x4x1xf32>
    %cst_10 = arith.constant 1.11111116 : f32
    %18 = vector.broadcast %cst_10 : f32 to vector<4x4x1xf32>
    %19 = arith.mulf %17, %18 : vector<4x4x1xf32>
    %c0_11 = arith.constant 0 : index
    %c0_12 = arith.constant 0 : index
    %c0_13 = arith.constant 0 : index
    %20 = vector.load %arg4[%c0_11, %c0_12, %c0_13] : memref<4x4x512xf32, #tpu.memory_space<vmem>>, vector<4x4x512xf32>
    %cst_14 = arith.constant 1.000000e-01 : f32
    %21 = vector.broadcast %cst_14 : f32 to vector<4x4x512xf32>
    %22 = arith.cmpf oge, %20, %21 : vector<4x4x512xf32>
    %23 = vector.broadcast %19 : vector<4x4x1xf32> to vector<4x4x512xf32>
    %24 = arith.mulf %13, %23 : vector<4x4x512xf32>
    %cst_15 = arith.constant 0.000000e+00 : f32
    %25 = vector.broadcast %cst_15 : f32 to vector<4x4x512xf32>
    %26 = arith.select %22, %24, %25 : vector<4x4x512xi1>, vector<4x4x512xf32>
    %27 = vector.shape_cast %4 : vector<512x8xf32> to vector<1x512x8xf32>
    %28 = vector.shape_cast %27 : vector<1x512x8xf32> to vector<1x512x8xf32>
    %29 = vector.broadcast %28 : vector<1x512x8xf32> to vector<4x512x8xf32>
    %cst_16 = arith.constant dense<0.000000e+00> : vector<4x4x8xf32>
    %30 = tpu.matmul %26, %29, %cst_16 {dimension_numbers = #tpu.dot_dimension_numbers<[2], [1], [1], [2], [0, 0, 0, 1, 1, 2], [0], [0]>} : vector<4x4x512xf32>, vector<4x512x8xf32>, vector<4x4x8xf32> -> vector<4x4x8xf32>
    %c0_17 = arith.constant 0 : index
    %c0_18 = arith.constant 0 : index
    %c0_19 = arith.constant 0 : index
    %31 = vector.load %arg5[%c0_17, %c0_18, %c0_19] : memref<4x4x8xf32, #tpu.memory_space<vmem>>, vector<4x4x8xf32>
    tpu.vector_store %arg5[%c0_17, %c0_18, %c0_19], %30 {strides = array<i32>} : memref<4x4x8xf32, #tpu.memory_space<vmem>>, vector<4x4x8xf32>,
    return
  }
  func.func @transform_0(%arg0: i32) -> (i32, i32) {
    %c0_i32 = arith.constant 0 : i32
    %c0_i32_0 = arith.constant 0 : i32
    %c0_i32_1 = arith.constant 0 : i32
    return %c0_i32, %c0_i32_0 : i32, i32
  }
  func.func @transform_1(%arg0: i32) -> (i32, i32, i32) {
    %c0_i32 = arith.constant 0 : i32
    %c0_i32_0 = arith.constant 0 : i32
    %c0_i32_1 = arith.constant 0 : i32
    return %arg0, %c0_i32, %c0_i32_0 : i32, i32, i32
  }
  func.func @transform_2(%arg0: i32) -> (i32, i32) {
    %c0_i32 = arith.constant 0 : i32
    %c0_i32_0 = arith.constant 0 : i32
    %c0_i32_1 = arith.constant 0 : i32
    return %c0_i32, %c0_i32_0 : i32, i32
  }
  func.func @transform_3(%arg0: i32) -> (i32, i32, i32) {
    %c0_i32 = arith.constant 0 : i32
    %c0_i32_0 = arith.constant 0 : i32
    %c0_i32_1 = arith.constant 0 : i32
    return %arg0, %c0_i32, %c0_i32_0 : i32, i32, i32
  }
  func.func @transform_4(%arg0: i32) -> (i32, i32, i32) {
    %c0_i32 = arith.constant 0 : i32
    %c0_i32_0 = arith.constant 0 : i32
    %c0_i32_1 = arith.constant 0 : i32
    return %arg0, %c0_i32, %c0_i32_0 : i32, i32, i32
  }
}

</mosaic_0001>

<bundles_post_ra>
// kernel: tpu_custom_call.1
= control target key start
LH: loop header
LB: loop body
LE: loop exit
PB: predicated region body
PF: predicated region fallthrough
CT: control target
= control target key end

     0   :  { %vm340_vm0 = vcmask 31744   ;;  %s5219_s0 = inlined_call_operand.vmem [shape: f32[4,4], index: 0, kind: input, shape index: {}]   ;;  %s5220_s1 = inlined_call_operand.vmem [shape: f32[4,512,4], index: 1, kind: input, shape index: {}]   ;;  %s5221_s2 = inlined_call_operand.vmem [shape: f32[512,8], index: 2, kind: input, shape index: {}]   ;;  %s5222_s3 = inlined_call_operand.vmem [shape: f32[4,4,512], index: 3, kind: input, shape index: {}]   ;;  %s5223_s4 = inlined_call_operand.hbm [shape: f32[4,4,8], index: 4, kind: output, shape index: {}]  }
   0x1   :  { %v51_v0 = vld [vmem:[%s5220_s1 + $0xf8] sm:$0xff]  ;;  %v50_v4 = vld [vmem:[%s5220_s1 + $0xf0] sm:$0xff]  ;;  %v49_v8 = vld [vmem:[%s5220_s1 + $0xe8] sm:$0xff] }
   0x2   :  { %v35_v1 = vld [vmem:[%s5220_s1 + $0x78] sm:$0xff]  ;;  %2762 = vmatprep.subr.msk.mxu0 %vm340_vm0, %v51_v0  ;;  %v82_v5 = vld [vmem:[%s5220_s1 + $0x1f0] sm:$0xff]  ;;  %v81_v9 = vld [vmem:[%s5220_s1 + $0x1e8] sm:$0xff] }
   0x3   :  { %v83_v2 = vld [vmem:[%s5220_s1 + $0x1f8] sm:$0xff]  ;;  %2763 = vmatpush3.xpose.msk.msra.mxu0 %vm340_vm0, %v35_v1  ;;  %v34_v6 = vld [vmem:[%s5220_s1 + $0x70] sm:$0xff]  ;;  %v33_v10 = vld [vmem:[%s5220_s1 + $0x68] sm:$0xff] }
   0x4   :  { %2796 = vmatprep.subr.msk.mxu1 %vm340_vm0, %v83_v2  ;;  %v67_v3 = vld [vmem:[%s5220_s1 + $0x178] sm:$0xff]  ;;  %2764 = vmatprep.subr.msk.mxu0 %vm340_vm0, %v50_v4  ;;  %v66_v7 = vld [vmem:[%s5220_s1 + $0x170] sm:$0xff]  ;;  %v65_v11 = vld [vmem:[%s5220_s1 + $0x168] sm:$0xff] }
   0x5   :  { %2797 = vmatpush3.xpose.msk.msra.mxu1 %vm340_vm0, %v67_v3  ;;  %v48_v12 = vld [vmem:[%s5220_s1 + $0xe0] sm:$0xff]  ;;  %v47_v16 = vld [vmem:[%s5220_s1 + $0xd8] sm:$0xff]  ;;  %v46_v20 = vld [vmem:[%s5220_s1 + $0xd0] sm:$0xff] }
   0x6   :  { %2798 = vmatprep.subr.msk.mxu1 %vm340_vm0, %v82_v5  ;;  %v80_v13 = vld [vmem:[%s5220_s1 + $0x1e0] sm:$0xff]  ;;  %v79_v17 = vld [vmem:[%s5220_s1 + $0x1d8] sm:$0xff]  ;;  %v78_v21 = vld [vmem:[%s5220_s1 + $0x1d0] sm:$0xff] }
   0x7   :  { %2765 = vmatpush3.xpose.msk.msra.mxu0 %vm340_vm0, %v34_v6  ;;  %v32_v14 = vld [vmem:[%s5220_s1 + $0x60] sm:$0xff]  ;;  %v31_v18 = vld [vmem:[%s5220_s1 + $0x58] sm:$0xff]  ;;  %v30_v22 = vld [vmem:[%s5220_s1 + $0x50] sm:$0xff] }
   0x8   :  { %2766 = vmatprep.subr.msk.mxu0 %vm340_vm0, %v49_v8  ;;  %v64_v15 = vld [vmem:[%s5220_s1 + $0x160] sm:$0xff]  ;;  %v63_v19 = vld [vmem:[%s5220_s1 + $0x158] sm:$0xff]  ;;  %v62_v23 = vld [vmem:[%s5220_s1 + $0x150] sm:$0xff] }
   0x9   :  { %2799 = vmatpush3.xpose.msk.msra.mxu1 %vm340_vm0, %v66_v7  ;;  %v45_v24 = vld [vmem:[%s5220_s1 + $0xc8] sm:$0xff]  ;;  %v18_v26 = vld [vmem:[%s5219_s0] sm:$0xf]  ;;  %v43_v34 = vld [vmem:[%s5220_s1 + $0xb8] sm:$0xff] }
   0xa   :  { %2800 = vmatprep.subr.msk.mxu1 %vm340_vm0, %v81_v9  ;;  %v77_v25 = vld [vmem:[%s5220_s1 + $0x1c8] sm:$0xff]  ;;  %v3512_v27 = vmul.f32 0.1, %v18_v26  ;;  %v44_v30 = vld [vmem:[%s5220_s1 + $0xc0] sm:$0xff]  ;;  %v75_v35 = vld [vmem:[%s5220_s1 + $0x1b8] sm:$0xff] }
   0xb   :  { %2767 = vmatpush3.xpose.msk.msra.mxu0 %vm340_vm0, %v33_v10  ;;  %v29_v28 = vld [vmem:[%s5220_s1 + $0x48] sm:$0xff]  ;;  %v76_v31 = vld [vmem:[%s5220_s1 + $0x1c0] sm:$0xff]  ;;  %v27_v36 = vld [vmem:[%s5220_s1 + $0x38] sm:$0xff] }
   0xc   :  { %2768 = vmatprep.subr.msk.mxu0 %vm340_vm0, %v48_v12  ;;  %v61_v29 = vld [vmem:[%s5220_s1 + $0x148] sm:$0xff]  ;;  %2794 = vmatprep.mubr.msk.f32.mxu0 %vm340_vm0, %v3512_v27  ;;  %v28_v32 = vld [vmem:[%s5220_s1 + $0x40] sm:$0xff]  ;;  %v59_v37 = vld [vmem:[%s5220_s1 + $0x138] sm:$0xff] }
   0xd   :  { %2801 = vmatpush3.xpose.msk.msra.mxu1 %vm340_vm0, %v65_v11  ;;  %2828 = vmatprep.mubr.msk.f32.mxu1 %vm340_vm0, %v3512_v27  ;;  %v60_v33 = vld [vmem:[%s5220_s1 + $0x140] sm:$0xff]  ;;  %v42_v38 = vld [vmem:[%s5220_s1 + $0xb0] sm:$0xff]  ;;  %v41_v42 = vld [vmem:[%s5220_s1 + $0xa8] sm:$0xff] }
   0xe   :  { %2802 = vmatprep.subr.msk.mxu1 %vm340_vm0, %v80_v13  ;;  %v74_v39 = vld [vmem:[%s5220_s1 + $0x1b0] sm:$0xff]  ;;  %v73_v43 = vld [vmem:[%s5220_s1 + $0x1a8] sm:$0xff]  ;;  %v40_v46 = vld [vmem:[%s5220_s1 + $0xa0] sm:$0xff] }
   0xf   :  { %2769 = vmatpush3.xpose.msk.msra.mxu0 %vm340_vm0, %v32_v14  ;;  %v26_v40 = vld [vmem:[%s5220_s1 + $0x30] sm:$0xff]  ;;  %v25_v44 = vld [vmem:[%s5220_s1 + $0x28] sm:$0xff]  ;;  %v72_v47 = vld [vmem:[%s5220_s1 + $0x1a0] sm:$0xff] }
  0x10   :  { %2770 = vmatprep.subr.msk.mxu0 %vm340_vm0, %v47_v16  ;;  %v58_v41 = vld [vmem:[%s5220_s1 + $0x130] sm:$0xff]  ;;  %v57_v45 = vld [vmem:[%s5220_s1 + $0x128] sm:$0xff]  ;;  %v24_v48 = vld [vmem:[%s5220_s1 + $0x20] sm:$0xff] }
  0x11   :  { %2803 = vmatpush3.xpose.msk.msra.mxu1 %vm340_vm0, %v64_v15  ;;  %v56_v49 = vld [vmem:[%s5220_s1 + $0x120] sm:$0xff]  ;;  %v39_v50 = vld [vmem:[%s5220_s1 + $0x98] sm:$0xff]  ;;  %v38_v54 = vld [vmem:[%s5220_s1 + $0x90] sm:$0xff] }
  0x12   :  { %2804 = vmatprep.subr.msk.mxu1 %vm340_vm0, %v79_v17  ;;  %v71_v51 = vld [vmem:[%s5220_s1 + $0x198] sm:$0xff]  ;;  %v70_v55 = vld [vmem:[%s5220_s1 + $0x190] sm:$0xff]  ;;  %v37_v58 = vld [vmem:[%s5220_s1 + $0x88] sm:$0xff] }
  0x13   :  { %2771 = vmatpush3.xpose.msk.msra.mxu0 %vm340_vm0, %v31_v18  ;;  %v23_v52 = vld [vmem:[%s5220_s1 + $0x18] sm:$0xff]  ;;  %v22_v56 = vld [vmem:[%s5220_s1 + $0x10] sm:$0xff]  ;;  %v69_v59 = vld [vmem:[%s5220_s1 + $0x188] sm:$0xff] }
  0x14   :  { %2772 = vmatprep.subr.msk.mxu0 %vm340_vm0, %v46_v20  ;;  %v55_v53 = vld [vmem:[%s5220_s1 + $0x118] sm:$0xff]  ;;  %v54_v57 = vld [vmem:[%s5220_s1 + $0x110] sm:$0xff]  ;;  %v21_v60 = vld [vmem:[%s5220_s1 + $0x8] sm:$0xff] }
  0x15   :  { %2805 = vmatpush3.xpose.msk.msra.mxu1 %vm340_vm0, %v63_v19  ;;  %v53_v61 = vld [vmem:[%s5220_s1 + $0x108] sm:$0xff]  ;;  %v36_v62 = vld [vmem:[%s5220_s1 + $0x80] sm:$0xff]  ;;  %v115_v2 = vld [vmem:[%s5220_s1 + $0x2f8] sm:$0xff] }
  0x16   :  { %2806 = vmatprep.subr.msk.mxu1 %vm340_vm0, %v78_v21  ;;  %v68_v63 = vld [vmem:[%s5220_s1 + $0x180] sm:$0xff]  ;;  %v147_v3 = vld [vmem:[%s5220_s1 + $0x3f8] sm:$0xff]  ;;  %v114_v6 = vld [vmem:[%s5220_s1 + $0x2f0] sm:$0xff] }
  0x17   :  { %2773 = vmatpush3.xpose.msk.msra.mxu0 %vm340_vm0, %v30_v22  ;;  %v20_v0 = vld [vmem:[%s5220_s1] sm:$0xff]  ;;  %v99_v4 = vld [vmem:[%s5220_s1 + $0x278] sm:$0xff]  ;;  %v146_v7 = vld [vmem:[%s5220_s1 + $0x3f0] sm:$0xff] }
  0x18   :  { %2774 = vmatprep.subr.msk.mxu0 %vm340_vm0, %v45_v24  ;;  %v52_v1 = vld [vmem:[%s5220_s1 + $0x100] sm:$0xff]  ;;  %v131_v5 = vld [vmem:[%s5220_s1 + $0x378] sm:$0xff] }
  0x19   :  { %2807 = vmatpush3.xpose.msk.msra.mxu1 %vm340_vm0, %v62_v23 }
  0x1a   :  { %2808 = vmatprep.subr.msk.mxu1 %vm340_vm0, %v77_v25 }
  0x1b   :  { %2775 = vmatpush3.xpose.msk.msra.mxu0 %vm340_vm0, %v29_v28 }
  0x1c   :  { %2776 = vmatprep.subr.msk.mxu0 %vm340_vm0, %v44_v30 }
  0x1d   :  { %2809 = vmatpush3.xpose.msk.msra.mxu1 %vm340_vm0, %v61_v29 }
  0x1e   :  { %2810 = vmatprep.subr.msk.mxu1 %vm340_vm0, %v76_v31 }
  0x1f   :  { %2777 = vmatpush3.xpose.msk.msra.mxu0 %vm340_vm0, %v28_v32 }
  0x20   :  { %2778 = vmatprep.subr.msk.mxu0 %vm340_vm0, %v43_v34 }
  0x21   :  { %2811 = vmatpush3.xpose.msk.msra.mxu1 %vm340_vm0, %v60_v33 }
  0x22   :  { %2812 = vmatprep.subr.msk.mxu1 %vm340_vm0, %v75_v35 }
  0x23   :  { %2779 = vmatpush3.xpose.msk.msra.mxu0 %vm340_vm0, %v27_v36 }
  0x24   :  { %2780 = vmatprep.subr.msk.mxu0 %vm340_vm0, %v42_v38 }
  0x25   :  { %2813 = vmatpush3.xpose.msk.msra.mxu1 %vm340_vm0, %v59_v37 }
  0x26   :  { %2814 = vmatprep.subr.msk.mxu1 %vm340_vm0, %v74_v39 }
  0x27   :  { %2781 = vmatpush3.xpose.msk.msra.mxu0 %vm340_vm0, %v26_v40 }
  0x28   :  { %2782 = vmatprep.subr.msk.mxu0 %vm340_vm0, %v41_v42 }
  0x29   :  { %2815 = vmatpush3.xpose.msk.msra.mxu1 %vm340_vm0, %v58_v41 }
  0x2a   :  { %2816 = vmatprep.subr.msk.mxu1 %vm340_vm0, %v73_v43 }
  0x2b   :  { %2783 = vmatpush3.xpose.msk.msra.mxu0 %vm340_vm0, %v25_v44 }
  0x2c   :  { %2784 = vmatprep.subr.msk.mxu0 %vm340_vm0, %v40_v46 }
  0x2d   :  { %2817 = vmatpush3.xpose.msk.msra.mxu1 %vm340_vm0, %v57_v45 }
  0x2e   :  { %2818 = vmatprep.subr.msk.mxu1 %vm340_vm0, %v72_v47 }
  0x2f   :  { %2785 = vmatpush3.xpose.msk.msra.mxu0 %vm340_vm0, %v24_v48 }
  0x30   :  { %2786 = vmatprep.subr.msk.mxu0 %vm340_vm0, %v39_v50 }
  0x31   :  { %2819 = vmatpush3.xpose.msk.msra.mxu1 %vm340_vm0, %v56_v49 }
  0x32   :  { %2820 = vmatprep.subr.msk.mxu1 %vm340_vm0, %v71_v51 }
  0x33   :  { %2787 = vmatpush3.xpose.msk.msra.mxu0 %vm340_vm0, %v23_v52 }
  0x34   :  { %2788 = vmatprep.subr.msk.mxu0 %vm340_vm0, %v38_v54 }
  0x35   :  { %2821 = vmatpush3.xpose.msk.msra.mxu1 %vm340_vm0, %v55_v53 }
  0x36   :  { %2822 = vmatprep.subr.msk.mxu1 %vm340_vm0, %v70_v55 }
  0x37   :  { %2789 = vmatpush3.xpose.msk.msra.mxu0 %vm340_vm0, %v22_v56 }
  0x38   :  { %2790 = vmatprep.subr.msk.mxu0 %vm340_vm0, %v37_v58 }
  0x39   :  { %2823 = vmatpush3.xpose.msk.msra.mxu1 %vm340_vm0, %v54_v57 }
  0x3a   :  { %2824 = vmatprep.subr.msk.mxu1 %vm340_vm0, %v69_v59 }
  0x3b   :  { %2791 = vmatpush3.xpose.msk.msra.mxu0 %vm340_vm0, %v21_v60 }
  0x3c   :  { %2792 = vmatprep.subr.msk.mxu0 %vm340_vm0, %v36_v62 }
  0x3d   :  { %2825 = vmatpush3.xpose.msk.msra.mxu1 %vm340_vm0, %v53_v61 }
  0x3e   :  { %2826 = vmatprep.subr.msk.mxu1 %vm340_vm0, %v68_v63 }
  0x3f   :  { %2793 = vmatpush3.xpose.msk.msra.mxu0 %vm340_vm0, %v20_v0 }
  0x40   :  { %2830 = vmatprep.subr.msk.mxu0 %vm340_vm0, %v115_v2 }
  0x41   :  { %2827 = vmatpush3.xpose.msk.msra.mxu1 %vm340_vm0, %v52_v1 }
  0x42   :  { %2864 = vmatprep.subr.msk.mxu1 %vm340_vm0, %v147_v3 }
  0x43   :  { %9 = vsyncpa [#allocation3], 0  ;;  %2795 = vmatmul.mubr.msk.f32.vlgmr.msra.gmra.mxu0 %vm340_vm0, %v3512_v27  ;;  %v98_v8 = vld [vmem:[%s5220_s1 + $0x270] sm:$0xff]  ;;  %v113_v10 = vld [vmem:[%s5220_s1 + $0x2e8] sm:$0xff]  ;;  %vm1680_vm1 = vcmask 1043456   ;;  %vm2469_vm10 = vcmask 60416  }
  0x44   :  { %2829 = vmatmul.mubr.msk.f32.vlgmr.msra.gmra.mxu1 %vm340_vm0, %v3512_v27  ;;  %2831 = vmatpush3.xpose.msk.msra.mxu0 %vm340_vm0, %v99_v4  ;;  %v130_v9 = vld [vmem:[%s5220_s1 + $0x370] sm:$0xff]  ;;  %v145_v11 = vld [vmem:[%s5220_s1 + $0x3e8] sm:$0xff]  ;;  %v112_v14 = vld [vmem:[%s5220_s1 + $0x2e0] sm:$0xff] }
  0x45   :  { %2865 = vmatpush3.xpose.msk.msra.mxu1 %vm340_vm0, %v131_v5  ;;  %2832 = vmatprep.subr.msk.mxu0 %vm340_vm0, %v114_v6  ;;  %v97_v12 = vld [vmem:[%s5220_s1 + $0x268] sm:$0xff]  ;;  %v144_v15 = vld [vmem:[%s5220_s1 + $0x3e0] sm:$0xff]  ;;  %v111_v18 = vld [vmem:[%s5220_s1 + $0x2d8] sm:$0xff] }
  0x46   :  { %2866 = vmatprep.subr.msk.mxu1 %vm340_vm0, %v146_v7  ;;  %2862 = vmatprep.mubr.msk.f32.mxu0 %vm340_vm0, %v3512_v27  ;;  %v129_v13 = vld [vmem:[%s5220_s1 + $0x368] sm:$0xff]  ;;  %v96_v16 = vld [vmem:[%s5220_s1 + $0x260] sm:$0xff]  ;;  %v143_v19 = vld [vmem:[%s5220_s1 + $0x3d8] sm:$0xff] }
  0x47   :  { %2896 = vmatprep.mubr.msk.f32.mxu1 %vm340_vm0, %v3512_v27  ;;  %v128_v17 = vld [vmem:[%s5220_s1 + $0x360] sm:$0xff]  ;;  %v95_v20 = vld [vmem:[%s5220_s1 + $0x258] sm:$0xff]  ;;  %v110_v22 = vld [vmem:[%s5220_s1 + $0x2d0] sm:$0xff] }
  0x48   :  { %2833 = vmatpush3.xpose.msk.msra.mxu0 %vm340_vm0, %v98_v8  ;;  %v127_v21 = vld [vmem:[%s5220_s1 + $0x358] sm:$0xff]  ;;  %v142_v23 = vld [vmem:[%s5220_s1 + $0x3d0] sm:$0xff]  ;;  %v109_v26 = vld [vmem:[%s5220_s1 + $0x2c8] sm:$0xff] }
  0x49   :  { %2867 = vmatpush3.xpose.msk.msra.mxu1 %vm340_vm0, %v130_v9  ;;  %2834 = vmatprep.subr.msk.mxu0 %vm340_vm0, %v113_v10  ;;  %v94_v24 = vld [vmem:[%s5220_s1 + $0x250] sm:$0xff]  ;;  %v141_v28 = vld [vmem:[%s5220_s1 + $0x3c8] sm:$0xff]  ;;  %v108_v31 = vld [vmem:[%s5220_s1 + $0x2c0] sm:$0xff] }
  0x4a   :  { %2868 = vmatprep.subr.msk.mxu1 %vm340_vm0, %v145_v11  ;;  %v126_v25 = vld [vmem:[%s5220_s1 + $0x350] sm:$0xff]  ;;  %v93_v29 = vld [vmem:[%s5220_s1 + $0x248] sm:$0xff]  ;;  %v140_v32 = vld [vmem:[%s5220_s1 + $0x3c0] sm:$0xff] }
  0x4b   :  { %v125_v30 = vld [vmem:[%s5220_s1 + $0x348] sm:$0xff]  ;;  %v92_v33 = vld [vmem:[%s5220_s1 + $0x240] sm:$0xff]  ;;  %v107_v35 = vld [vmem:[%s5220_s1 + $0x2b8] sm:$0xff] }
  0x4c   :  { %2835 = vmatpush3.xpose.msk.msra.mxu0 %vm340_vm0, %v97_v12  ;;  %v124_v34 = vld [vmem:[%s5220_s1 + $0x340] sm:$0xff]  ;;  %v139_v36 = vld [vmem:[%s5220_s1 + $0x3b8] sm:$0xff]  ;;  %v106_v39 = vld [vmem:[%s5220_s1 + $0x2b0] sm:$0xff] }
  0x4d   :  { %2869 = vmatpush3.xpose.msk.msra.mxu1 %vm340_vm0, %v129_v13  ;;  %2836 = vmatprep.subr.msk.mxu0 %vm340_vm0, %v112_v14  ;;  %v91_v37 = vld [vmem:[%s5220_s1 + $0x238] sm:$0xff]  ;;  %v138_v40 = vld [vmem:[%s5220_s1 + $0x3b0] sm:$0xff]  ;;  %v105_v43 = vld [vmem:[%s5220_s1 + $0x2a8] sm:$0xff] }
  0x4e   :  { %2870 = vmatprep.subr.msk.mxu1 %vm340_vm0, %v144_v15  ;;  %v123_v38 = vld [vmem:[%s5220_s1 + $0x338] sm:$0xff]  ;;  %v90_v41 = vld [vmem:[%s5220_s1 + $0x230] sm:$0xff]  ;;  %v137_v44 = vld [vmem:[%s5220_s1 + $0x3a8] sm:$0xff] }
  0x4f   :  { %v122_v42 = vld [vmem:[%s5220_s1 + $0x330] sm:$0xff]  ;;  %v89_v45 = vld [vmem:[%s5220_s1 + $0x228] sm:$0xff]  ;;  %v104_v47 = vld [vmem:[%s5220_s1 + $0x2a0] sm:$0xff] }
  0x50   :  { %2837 = vmatpush3.xpose.msk.msra.mxu0 %vm340_vm0, %v96_v16  ;;  %v121_v46 = vld [vmem:[%s5220_s1 + $0x328] sm:$0xff]  ;;  %v136_v48 = vld [vmem:[%s5220_s1 + $0x3a0] sm:$0xff]  ;;  %v103_v51 = vld [vmem:[%s5220_s1 + $0x298] sm:$0xff] }
  0x51   :  { %2871 = vmatpush3.xpose.msk.msra.mxu1 %vm340_vm0, %v128_v17  ;;  %2838 = vmatprep.subr.msk.mxu0 %vm340_vm0, %v111_v18  ;;  %v88_v49 = vld [vmem:[%s5220_s1 + $0x220] sm:$0xff]  ;;  %v135_v52 = vld [vmem:[%s5220_s1 + $0x398] sm:$0xff]  ;;  %v102_v55 = vld [vmem:[%s5220_s1 + $0x290] sm:$0xff] }
  0x52   :  { %2872 = vmatprep.subr.msk.mxu1 %vm340_vm0, %v143_v19  ;;  %v120_v50 = vld [vmem:[%s5220_s1 + $0x320] sm:$0xff]  ;;  %v87_v53 = vld [vmem:[%s5220_s1 + $0x218] sm:$0xff]  ;;  %v134_v56 = vld [vmem:[%s5220_s1 + $0x390] sm:$0xff] }
  0x53   :  { %v119_v54 = vld [vmem:[%s5220_s1 + $0x318] sm:$0xff]  ;;  %v86_v57 = vld [vmem:[%s5220_s1 + $0x210] sm:$0xff]  ;;  %v101_v59 = vld [vmem:[%s5220_s1 + $0x288] sm:$0xff] }
  0x54   :  { %2839 = vmatpush3.xpose.msk.msra.mxu0 %vm340_vm0, %v95_v20  ;;  %v118_v58 = vld [vmem:[%s5220_s1 + $0x310] sm:$0xff]  ;;  %v133_v60 = vld [vmem:[%s5220_s1 + $0x388] sm:$0xff]  ;;  %v100_v63 = vld [vmem:[%s5220_s1 + $0x280] sm:$0xff] }
  0x55   :  { %2873 = vmatpush3.xpose.msk.msra.mxu1 %vm340_vm0, %v127_v21  ;;  %2840 = vmatprep.subr.msk.mxu0 %vm340_vm0, %v110_v22  ;;  %v85_v61 = vld [vmem:[%s5220_s1 + $0x208] sm:$0xff]  ;;  %v132_v0 = vld [vmem:[%s5220_s1 + $0x380] sm:$0xff]  ;;  %v179_v3 = vld [vmem:[%s5220_s1 + $0x4f8] sm:$0xff] }
  0x56   :  { %2874 = vmatprep.subr.msk.mxu1 %vm340_vm0, %v142_v23  ;;  %v117_v62 = vld [vmem:[%s5220_s1 + $0x308] sm:$0xff]  ;;  %v84_v1 = vld [vmem:[%s5220_s1 + $0x200] sm:$0xff]  ;;  %v211_v4 = vld [vmem:[%s5220_s1 + $0x5f8] sm:$0xff] }
  0x57   :  { %v116_v2 = vld [vmem:[%s5220_s1 + $0x300] sm:$0xff]  ;;  %v163_v5 = vld [vmem:[%s5220_s1 + $0x478] sm:$0xff]  ;;  %v178_v7 = vld [vmem:[%s5220_s1 + $0x4f0] sm:$0xff] }
  0x58   :  { %2841 = vmatpush3.xpose.msk.msra.mxu0 %vm340_vm0, %v94_v24  ;;  %v195_v6 = vld [vmem:[%s5220_s1 + $0x578] sm:$0xff]  ;;  %v210_v8 = vld [vmem:[%s5220_s1 + $0x5f0] sm:$0xff]  ;;  %v177_v11 = vld [vmem:[%s5220_s1 + $0x4e8] sm:$0xff] }
  0x59   :  { %2875 = vmatpush3.xpose.msk.msra.mxu1 %vm340_vm0, %v126_v25  ;;  %2842 = vmatprep.subr.msk.mxu0 %vm340_vm0, %v109_v26  ;;  %v162_v9 = vld [vmem:[%s5220_s1 + $0x470] sm:$0xff]  ;;  %v209_v12 = vld [vmem:[%s5220_s1 + $0x5e8] sm:$0xff]  ;;  %v176_v15 = vld [vmem:[%s5220_s1 + $0x4e0] sm:$0xff] }
  0x5a   :  { %2876 = vmatprep.subr.msk.mxu1 %vm340_vm0, %v141_v28  ;;  %v194_v10 = vld [vmem:[%s5220_s1 + $0x570] sm:$0xff]  ;;  %v161_v13 = vld [vmem:[%s5220_s1 + $0x468] sm:$0xff]  ;;  %v208_v16 = vld [vmem:[%s5220_s1 + $0x5e0] sm:$0xff] }
  0x5b   :  { %v193_v14 = vld [vmem:[%s5220_s1 + $0x568] sm:$0xff]  ;;  %v160_v17 = vld [vmem:[%s5220_s1 + $0x460] sm:$0xff]  ;;  %v175_v19 = vld [vmem:[%s5220_s1 + $0x4d8] sm:$0xff] }
  0x5c   :  { %2843 = vmatpush3.xpose.msk.msra.mxu0 %vm340_vm0, %v93_v29  ;;  %v192_v18 = vld [vmem:[%s5220_s1 + $0x560] sm:$0xff]  ;;  %v207_v20 = vld [vmem:[%s5220_s1 + $0x5d8] sm:$0xff]  ;;  %v174_v23 = vld [vmem:[%s5220_s1 + $0x4d0] sm:$0xff] }
  0x5d   :  { %2877 = vmatpush3.xpose.msk.msra.mxu1 %vm340_vm0, %v125_v30  ;;  %2844 = vmatprep.subr.msk.mxu0 %vm340_vm0, %v108_v31  ;;  %v159_v21 = vld [vmem:[%s5220_s1 + $0x458] sm:$0xff]  ;;  %v206_v24 = vld [vmem:[%s5220_s1 + $0x5d0] sm:$0xff]  ;;  %v173_v28 = vld [vmem:[%s5220_s1 + $0x4c8] sm:$0xff] }
  0x5e   :  { %2878 = vmatprep.subr.msk.mxu1 %vm340_vm0, %v140_v32  ;;  %v191_v22 = vld [vmem:[%s5220_s1 + $0x558] sm:$0xff]  ;;  %v158_v25 = vld [vmem:[%s5220_s1 + $0x450] sm:$0xff]  ;;  %v205_v29 = vld [vmem:[%s5220_s1 + $0x5c8] sm:$0xff] }
  0x5f   :  { %v190_v26 = vld [vmem:[%s5220_s1 + $0x550] sm:$0xff]  ;;  %v157_v30 = vld [vmem:[%s5220_s1 + $0x448] sm:$0xff]  ;;  %v172_v32 = vld [vmem:[%s5220_s1 + $0x4c0] sm:$0xff] }
  0x60   :  { %2845 = vmatpush3.xpose.msk.msra.mxu0 %vm340_vm0, %v92_v33  ;;  %v189_v31 = vld [vmem:[%s5220_s1 + $0x548] sm:$0xff]  ;;  %v204_v33 = vld [vmem:[%s5220_s1 + $0x5c0] sm:$0xff] }
  0x61   :  { %2879 = vmatpush3.xpose.msk.msra.mxu1 %vm340_vm0, %v124_v34  ;;  %2846 = vmatprep.subr.msk.mxu0 %vm340_vm0, %v107_v35  ;;  %v156_v34 = vld [vmem:[%s5220_s1 + $0x440] sm:$0xff] }
  0x62   :  { %2880 = vmatprep.subr.msk.mxu1 %vm340_vm0, %v139_v36  ;;  %v188_v35 = vld [vmem:[%s5220_s1 + $0x540] sm:$0xff]  ;;  %v171_v36 = vld [vmem:[%s5220_s1 + $0x4b8] sm:$0xff] }
  0x64   :  { %2847 = vmatpush3.xpose.msk.msra.mxu0 %vm340_vm0, %v91_v37  ;;  %v203_v37 = vld [vmem:[%s5220_s1 + $0x5b8] sm:$0xff] }
  0x65   :  { %2881 = vmatpush3.xpose.msk.msra.mxu1 %vm340_vm0, %v123_v38  ;;  %2848 = vmatprep.subr.msk.mxu0 %vm340_vm0, %v106_v39  ;;  %v155_v38 = vld [vmem:[%s5220_s1 + $0x438] sm:$0xff] }
  0x66   :  { %2882 = vmatprep.subr.msk.mxu1 %vm340_vm0, %v138_v40  ;;  %v187_v39 = vld [vmem:[%s5220_s1 + $0x538] sm:$0xff]  ;;  %v170_v40 = vld [vmem:[%s5220_s1 + $0x4b0] sm:$0xff] }
  0x68   :  { %2849 = vmatpush3.xpose.msk.msra.mxu0 %vm340_vm0, %v90_v41  ;;  %v202_v41 = vld [vmem:[%s5220_s1 + $0x5b0] sm:$0xff] }
  0x69   :  { %2883 = vmatpush3.xpose.msk.msra.mxu1 %vm340_vm0, %v122_v42  ;;  %2850 = vmatprep.subr.msk.mxu0 %vm340_vm0, %v105_v43  ;;  %v154_v42 = vld [vmem:[%s5220_s1 + $0x430] sm:$0xff] }
  0x6a   :  { %2884 = vmatprep.subr.msk.mxu1 %vm340_vm0, %v137_v44  ;;  %v186_v43 = vld [vmem:[%s5220_s1 + $0x530] sm:$0xff]  ;;  %v169_v44 = vld [vmem:[%s5220_s1 + $0x4a8] sm:$0xff] }
  0x6c   :  { %2851 = vmatpush3.xpose.msk.msra.mxu0 %vm340_vm0, %v89_v45  ;;  %v201_v45 = vld [vmem:[%s5220_s1 + $0x5a8] sm:$0xff] }
  0x6d   :  { %2885 = vmatpush3.xpose.msk.msra.mxu1 %vm340_vm0, %v121_v46  ;;  %2852 = vmatprep.subr.msk.mxu0 %vm340_vm0, %v104_v47  ;;  %v153_v46 = vld [vmem:[%s5220_s1 + $0x428] sm:$0xff] }
  0x6e   :  { %2886 = vmatprep.subr.msk.mxu1 %vm340_vm0, %v136_v48  ;;  %v185_v47 = vld [vmem:[%s5220_s1 + $0x528] sm:$0xff]  ;;  %v168_v48 = vld [vmem:[%s5220_s1 + $0x4a0] sm:$0xff] }
  0x70   :  { %2853 = vmatpush3.xpose.msk.msra.mxu0 %vm340_vm0, %v88_v49  ;;  %v200_v49 = vld [vmem:[%s5220_s1 + $0x5a0] sm:$0xff] }
  0x71   :  { %2887 = vmatpush3.xpose.msk.msra.mxu1 %vm340_vm0, %v120_v50  ;;  %2854 = vmatprep.subr.msk.mxu0 %vm340_vm0, %v103_v51  ;;  %v152_v50 = vld [vmem:[%s5220_s1 + $0x420] sm:$0xff] }
  0x72   :  { %2888 = vmatprep.subr.msk.mxu1 %vm340_vm0, %v135_v52  ;;  %v184_v51 = vld [vmem:[%s5220_s1 + $0x520] sm:$0xff]  ;;  %v167_v52 = vld [vmem:[%s5220_s1 + $0x498] sm:$0xff] }
  0x74   :  { %2855 = vmatpush3.xpose.msk.msra.mxu0 %vm340_vm0, %v87_v53  ;;  %v199_v53 = vld [vmem:[%s5220_s1 + $0x598] sm:$0xff] }
  0x75   :  { %2889 = vmatpush3.xpose.msk.msra.mxu1 %vm340_vm0, %v119_v54  ;;  %2856 = vmatprep.subr.msk.mxu0 %vm340_vm0, %v102_v55  ;;  %v151_v54 = vld [vmem:[%s5220_s1 + $0x418] sm:$0xff] }
  0x76   :  { %2890 = vmatprep.subr.msk.mxu1 %vm340_vm0, %v134_v56  ;;  %v183_v55 = vld [vmem:[%s5220_s1 + $0x518] sm:$0xff]  ;;  %v166_v56 = vld [vmem:[%s5220_s1 + $0x490] sm:$0xff] }
  0x78   :  { %2857 = vmatpush3.xpose.msk.msra.mxu0 %vm340_vm0, %v86_v57  ;;  %v198_v57 = vld [vmem:[%s5220_s1 + $0x590] sm:$0xff] }
  0x79   :  { %2891 = vmatpush3.xpose.msk.msra.mxu1 %vm340_vm0, %v118_v58  ;;  %2858 = vmatprep.subr.msk.mxu0 %vm340_vm0, %v101_v59  ;;  %v150_v58 = vld [vmem:[%s5220_s1 + $0x410] sm:$0xff] }
  0x7a   :  { %2892 = vmatprep.subr.msk.mxu1 %vm340_vm0, %v133_v60  ;;  %v182_v59 = vld [vmem:[%s5220_s1 + $0x510] sm:$0xff]  ;;  %v165_v60 = vld [vmem:[%s5220_s1 + $0x488] sm:$0xff] }
  0x7c   :  { %2859 = vmatpush3.xpose.msk.msra.mxu0 %vm340_vm0, %v85_v61  ;;  %v197_v61 = vld [vmem:[%s5220_s1 + $0x588] sm:$0xff] }
  0x7d   :  { %2893 = vmatpush3.xpose.msk.msra.mxu1 %vm340_vm0, %v117_v62  ;;  %2860 = vmatprep.subr.msk.mxu0 %vm340_vm0, %v100_v63  ;;  %v149_v62 = vld [vmem:[%s5220_s1 + $0x408] sm:$0xff] }
  0x7e   :  { %2894 = vmatprep.subr.msk.mxu1 %vm340_vm0, %v132_v0  ;;  %v181_v63 = vld [vmem:[%s5220_s1 + $0x508] sm:$0xff]  ;;  %v164_v0 = vld [vmem:[%s5220_s1 + $0x480] sm:$0xff] }
  0x80   :  { %2861 = vmatpush3.xpose.msk.msra.mxu0 %vm340_vm0, %v84_v1  ;;  %v196_v1 = vld [vmem:[%s5220_s1 + $0x580] sm:$0xff] }
  0x81   :  { %2895 = vmatpush3.xpose.msk.msra.mxu1 %vm340_vm0, %v116_v2  ;;  %2898 = vmatprep.subr.msk.mxu0 %vm340_vm0, %v179_v3  ;;  %v148_v2 = vld [vmem:[%s5220_s1 + $0x400] sm:$0xff] }
  0x82   :  { %2932 = vmatprep.subr.msk.mxu1 %vm340_vm0, %v211_v4  ;;  %v180_v3 = vld [vmem:[%s5220_s1 + $0x500] sm:$0xff]  ;;  %v243_v4 = vld [vmem:[%s5220_s1 + $0x6f8] sm:$0xff] }
  0x83   :  { %2863 = vmatmul.mubr.msk.f32.vlgmr.msra.gmra.mxu0 %vm340_vm0, %v3512_v27 }
  0x84   :  { %2897 = vmatmul.mubr.msk.f32.vlgmr.msra.gmra.mxu1 %vm340_vm0, %v3512_v27  ;;  %2899 = vmatpush3.xpose.msk.msra.mxu0 %vm340_vm0, %v163_v5  ;;  %v275_v5 = vld [vmem:[%s5220_s1 + $0x7f8] sm:$0xff] }
  0x85   :  { %2933 = vmatpush3.xpose.msk.msra.mxu1 %vm340_vm0, %v195_v6  ;;  %2900 = vmatprep.subr.msk.mxu0 %vm340_vm0, %v178_v7  ;;  %v227_v6 = vld [vmem:[%s5220_s1 + $0x678] sm:$0xff] }
  0x86   :  { %2934 = vmatprep.subr.msk.mxu1 %vm340_vm0, %v210_v8  ;;  %2930 = vmatprep.mubr.msk.f32.mxu0 %vm340_vm0, %v3512_v27  ;;  %v259_v7 = vld [vmem:[%s5220_s1 + $0x778] sm:$0xff]  ;;  %v242_v8 = vld [vmem:[%s5220_s1 + $0x6f0] sm:$0xff] }
  0x87   :  { %2964 = vmatprep.mubr.msk.f32.mxu1 %vm340_vm0, %v3512_v27 }
  0x88   :  { %2901 = vmatpush3.xpose.msk.msra.mxu0 %vm340_vm0, %v162_v9  ;;  %v274_v9 = vld [vmem:[%s5220_s1 + $0x7f0] sm:$0xff] }
  0x89   :  { %2935 = vmatpush3.xpose.msk.msra.mxu1 %vm340_vm0, %v194_v10  ;;  %2902 = vmatprep.subr.msk.mxu0 %vm340_vm0, %v177_v11  ;;  %v226_v10 = vld [vmem:[%s5220_s1 + $0x670] sm:$0xff] }
  0x8a   :  { %2936 = vmatprep.subr.msk.mxu1 %vm340_vm0, %v209_v12  ;;  %v258_v11 = vld [vmem:[%s5220_s1 + $0x770] sm:$0xff]  ;;  %v241_v12 = vld [vmem:[%s5220_s1 + $0x6e8] sm:$0xff] }
  0x8c   :  { %2903 = vmatpush3.xpose.msk.msra.mxu0 %vm340_vm0, %v161_v13  ;;  %v273_v13 = vld [vmem:[%s5220_s1 + $0x7e8] sm:$0xff] }
  0x8d   :  { %2937 = vmatpush3.xpose.msk.msra.mxu1 %vm340_vm0, %v193_v14  ;;  %2904 = vmatprep.subr.msk.mxu0 %vm340_vm0, %v176_v15  ;;  %v225_v14 = vld [vmem:[%s5220_s1 + $0x668] sm:$0xff] }
  0x8e   :  { %2938 = vmatprep.subr.msk.mxu1 %vm340_vm0, %v208_v16  ;;  %v257_v15 = vld [vmem:[%s5220_s1 + $0x768] sm:$0xff]  ;;  %v240_v16 = vld [vmem:[%s5220_s1 + $0x6e0] sm:$0xff] }
  0x90   :  { %2905 = vmatpush3.xpose.msk.msra.mxu0 %vm340_vm0, %v160_v17  ;;  %v272_v17 = vld [vmem:[%s5220_s1 + $0x7e0] sm:$0xff] }
  0x91   :  { %2939 = vmatpush3.xpose.msk.msra.mxu1 %vm340_vm0, %v192_v18  ;;  %2906 = vmatprep.subr.msk.mxu0 %vm340_vm0, %v175_v19  ;;  %v224_v18 = vld [vmem:[%s5220_s1 + $0x660] sm:$0xff] }
  0x92   :  { %2940 = vmatprep.subr.msk.mxu1 %vm340_vm0, %v207_v20  ;;  %v256_v19 = vld [vmem:[%s5220_s1 + $0x760] sm:$0xff]  ;;  %v239_v20 = vld [vmem:[%s5220_s1 + $0x6d8] sm:$0xff] }
  0x94   :  { %2907 = vmatpush3.xpose.msk.msra.mxu0 %vm340_vm0, %v159_v21  ;;  %v271_v21 = vld [vmem:[%s5220_s1 + $0x7d8] sm:$0xff] }
  0x95   :  { %2941 = vmatpush3.xpose.msk.msra.mxu1 %vm340_vm0, %v191_v22  ;;  %2908 = vmatprep.subr.msk.mxu0 %vm340_vm0, %v174_v23  ;;  %v223_v22 = vld [vmem:[%s5220_s1 + $0x658] sm:$0xff] }
  0x96   :  { %2942 = vmatprep.subr.msk.mxu1 %vm340_vm0, %v206_v24  ;;  %v255_v23 = vld [vmem:[%s5220_s1 + $0x758] sm:$0xff]  ;;  %v238_v24 = vld [vmem:[%s5220_s1 + $0x6d0] sm:$0xff] }
  0x98   :  { %2909 = vmatpush3.xpose.msk.msra.mxu0 %vm340_vm0, %v158_v25  ;;  %v270_v25 = vld [vmem:[%s5220_s1 + $0x7d0] sm:$0xff] }
  0x99   :  { %2943 = vmatpush3.xpose.msk.msra.mxu1 %vm340_vm0, %v190_v26  ;;  %2910 = vmatprep.subr.msk.mxu0 %vm340_vm0, %v173_v28  ;;  %v222_v26 = vld [vmem:[%s5220_s1 + $0x650] sm:$0xff] }
  0x9a   :  { %2944 = vmatprep.subr.msk.mxu1 %vm340_vm0, %v205_v29  ;;  %v254_v28 = vld [vmem:[%s5220_s1 + $0x750] sm:$0xff]  ;;  %v237_v29 = vld [vmem:[%s5220_s1 + $0x6c8] sm:$0xff] }
  0x9c   :  { %2911 = vmatpush3.xpose.msk.msra.mxu0 %vm340_vm0, %v157_v30  ;;  %v269_v30 = vld [vmem:[%s5220_s1 + $0x7c8] sm:$0xff] }
  0x9d   :  { %2945 = vmatpush3.xpose.msk.msra.mxu1 %vm340_vm0, %v189_v31  ;;  %2912 = vmatprep.subr.msk.mxu0 %vm340_vm0, %v172_v32  ;;  %v221_v31 = vld [vmem:[%s5220_s1 + $0x648] sm:$0xff] }
  0x9e   :  { %2946 = vmatprep.subr.msk.mxu1 %vm340_vm0, %v204_v33  ;;  %v253_v32 = vld [vmem:[%s5220_s1 + $0x748] sm:$0xff]  ;;  %v236_v33 = vld [vmem:[%s5220_s1 + $0x6c0] sm:$0xff] }
  0xa0   :  { %2913 = vmatpush3.xpose.msk.msra.mxu0 %vm340_vm0, %v156_v34  ;;  %v268_v34 = vld [vmem:[%s5220_s1 + $0x7c0] sm:$0xff] }
  0xa1   :  { %2947 = vmatpush3.xpose.msk.msra.mxu1 %vm340_vm0, %v188_v35  ;;  %2914 = vmatprep.subr.msk.mxu0 %vm340_vm0, %v171_v36  ;;  %v220_v35 = vld [vmem:[%s5220_s1 + $0x640] sm:$0xff] }
  0xa2   :  { %2948 = vmatprep.subr.msk.mxu1 %vm340_vm0, %v203_v37  ;;  %v252_v36 = vld [vmem:[%s5220_s1 + $0x740] sm:$0xff]  ;;  %v235_v37 = vld [vmem:[%s5220_s1 + $0x6b8] sm:$0xff] }
  0xa4   :  { %2915 = vmatpush3.xpose.msk.msra.mxu0 %vm340_vm0, %v155_v38  ;;  %v267_v38 = vld [vmem:[%s5220_s1 + $0x7b8] sm:$0xff] }
  0xa5   :  { %2949 = vmatpush3.xpose.msk.msra.mxu1 %vm340_vm0, %v187_v39  ;;  %2916 = vmatprep.subr.msk.mxu0 %vm340_vm0, %v170_v40  ;;  %v219_v39 = vld [vmem:[%s5220_s1 + $0x638] sm:$0xff] }
  0xa6   :  { %2950 = vmatprep.subr.msk.mxu1 %vm340_vm0, %v202_v41  ;;  %v251_v40 = vld [vmem:[%s5220_s1 + $0x738] sm:$0xff]  ;;  %v234_v41 = vld [vmem:[%s5220_s1 + $0x6b0] sm:$0xff] }
  0xa8   :  { %2917 = vmatpush3.xpose.msk.msra.mxu0 %vm340_vm0, %v154_v42  ;;  %v266_v42 = vld [vmem:[%s5220_s1 + $0x7b0] sm:$0xff] }
  0xa9   :  { %2951 = vmatpush3.xpose.msk.msra.mxu1 %vm340_vm0, %v186_v43  ;;  %2918 = vmatprep.subr.msk.mxu0 %vm340_vm0, %v169_v44  ;;  %v218_v43 = vld [vmem:[%s5220_s1 + $0x630] sm:$0xff] }
  0xaa   :  { %2952 = vmatprep.subr.msk.mxu1 %vm340_vm0, %v201_v45  ;;  %v250_v44 = vld [vmem:[%s5220_s1 + $0x730] sm:$0xff]  ;;  %v233_v45 = vld [vmem:[%s5220_s1 + $0x6a8] sm:$0xff] }
  0xac   :  { %2919 = vmatpush3.xpose.msk.msra.mxu0 %vm340_vm0, %v153_v46  ;;  %v265_v46 = vld [vmem:[%s5220_s1 + $0x7a8] sm:$0xff] }
  0xad   :  { %2953 = vmatpush3.xpose.msk.msra.mxu1 %vm340_vm0, %v185_v47  ;;  %2920 = vmatprep.subr.msk.mxu0 %vm340_vm0, %v168_v48  ;;  %v217_v47 = vld [vmem:[%s5220_s1 + $0x628] sm:$0xff] }
  0xae   :  { %2954 = vmatprep.subr.msk.mxu1 %vm340_vm0, %v200_v49  ;;  %v249_v48 = vld [vmem:[%s5220_s1 + $0x728] sm:$0xff]  ;;  %v232_v49 = vld [vmem:[%s5220_s1 + $0x6a0] sm:$0xff] }
  0xb0   :  { %2921 = vmatpush3.xpose.msk.msra.mxu0 %vm340_vm0, %v152_v50  ;;  %v264_v50 = vld [vmem:[%s5220_s1 + $0x7a0] sm:$0xff] }
  0xb1   :  { %2955 = vmatpush3.xpose.msk.msra.mxu1 %vm340_vm0, %v184_v51  ;;  %2922 = vmatprep.subr.msk.mxu0 %vm340_vm0, %v167_v52  ;;  %v216_v51 = vld [vmem:[%s5220_s1 + $0x620] sm:$0xff] }
  0xb2   :  { %2956 = vmatprep.subr.msk.mxu1 %vm340_vm0, %v199_v53  ;;  %v248_v52 = vld [vmem:[%s5220_s1 + $0x720] sm:$0xff]  ;;  %v231_v53 = vld [vmem:[%s5220_s1 + $0x698] sm:$0xff] }
  0xb4   :  { %2923 = vmatpush3.xpose.msk.msra.mxu0 %vm340_vm0, %v151_v54  ;;  %v263_v54 = vld [vmem:[%s5220_s1 + $0x798] sm:$0xff] }
  0xb5   :  { %2957 = vmatpush3.xpose.msk.msra.mxu1 %vm340_vm0, %v183_v55  ;;  %2924 = vmatprep.subr.msk.mxu0 %vm340_vm0, %v166_v56  ;;  %v215_v55 = vld [vmem:[%s5220_s1 + $0x618] sm:$0xff] }
  0xb6   :  { %2958 = vmatprep.subr.msk.mxu1 %vm340_vm0, %v198_v57  ;;  %v247_v56 = vld [vmem:[%s5220_s1 + $0x718] sm:$0xff]  ;;  %v230_v57 = vld [vmem:[%s5220_s1 + $0x690] sm:$0xff] }
  0xb8   :  { %2925 = vmatpush3.xpose.msk.msra.mxu0 %vm340_vm0, %v150_v58  ;;  %v262_v58 = vld [vmem:[%s5220_s1 + $0x790] sm:$0xff] }
  0xb9   :  { %2959 = vmatpush3.xpose.msk.msra.mxu1 %vm340_vm0, %v182_v59  ;;  %2926 = vmatprep.subr.msk.mxu0 %vm340_vm0, %v165_v60  ;;  %v214_v59 = vld [vmem:[%s5220_s1 + $0x610] sm:$0xff] }
  0xba   :  { %2960 = vmatprep.subr.msk.mxu1 %vm340_vm0, %v197_v61  ;;  %v246_v60 = vld [vmem:[%s5220_s1 + $0x710] sm:$0xff]  ;;  %v229_v61 = vld [vmem:[%s5220_s1 + $0x688] sm:$0xff] }
  0xbc   :  { %2927 = vmatpush3.xpose.msk.msra.mxu0 %vm340_vm0, %v149_v62  ;;  %v261_v62 = vld [vmem:[%s5220_s1 + $0x788] sm:$0xff] }
  0xbd   :  { %2961 = vmatpush3.xpose.msk.msra.mxu1 %vm340_vm0, %v181_v63  ;;  %2928 = vmatprep.subr.msk.mxu0 %vm340_vm0, %v164_v0  ;;  %v213_v63 = vld [vmem:[%s5220_s1 + $0x608] sm:$0xff] }
  0xbe   :  { %2962 = vmatprep.subr.msk.mxu1 %vm340_vm0, %v196_v1  ;;  %v245_v0 = vld [vmem:[%s5220_s1 + $0x708] sm:$0xff]  ;;  %v228_v1 = vld [vmem:[%s5220_s1 + $0x680] sm:$0xff] }
  0xc0   :  { %2929 = vmatpush3.xpose.msk.msra.mxu0 %vm340_vm0, %v148_v2  ;;  %v260_v2 = vld [vmem:[%s5220_s1 + $0x780] sm:$0xff] }
  0xc1   :  { %2963 = vmatpush3.xpose.msk.msra.mxu1 %vm340_vm0, %v180_v3  ;;  %2966 = vmatprep.subr.msk.mxu0 %vm340_vm0, %v243_v4  ;;  %v212_v3 = vld [vmem:[%s5220_s1 + $0x600] sm:$0xff] }
  0xc2   :  { %3000 = vmatprep.subr.msk.mxu1 %vm340_vm0, %v275_v5  ;;  %v244_v4 = vld [vmem:[%s5220_s1 + $0x700] sm:$0xff] }
  0xc3   :  { %2931 = vmatmul.mubr.msk.f32.vlgmr.msra.gmra.mxu0 %vm340_vm0, %v3512_v27 }
  0xc4   :  { %2965 = vmatmul.mubr.msk.f32.vlgmr.msra.gmra.mxu1 %vm340_vm0, %v3512_v27  ;;  %2967 = vmatpush3.xpose.msk.msra.mxu0 %vm340_vm0, %v227_v6 }
  0xc5   :  { %3001 = vmatpush3.xpose.msk.msra.mxu1 %vm340_vm0, %v259_v7  ;;  %2968 = vmatprep.subr.msk.mxu0 %vm340_vm0, %v242_v8 }
  0xc6   :  { %3002 = vmatprep.subr.msk.mxu1 %vm340_vm0, %v274_v9  ;;  %2998 = vmatprep.mubr.msk.f32.mxu0 %vm340_vm0, %v3512_v27 }
  0xc7   :  { %3032 = vmatprep.mubr.msk.f32.mxu1 %vm340_vm0, %v3512_v27 }
  0xc8   :  { %2969 = vmatpush3.xpose.msk.msra.mxu0 %vm340_vm0, %v226_v10 }
  0xc9   :  { %3003 = vmatpush3.xpose.msk.msra.mxu1 %vm340_vm0, %v258_v11  ;;  %2970 = vmatprep.subr.msk.mxu0 %vm340_vm0, %v241_v12 }
  0xca   :  { %3004 = vmatprep.subr.msk.mxu1 %vm340_vm0, %v273_v13 }
  0xcc   :  { %2971 = vmatpush3.xpose.msk.msra.mxu0 %vm340_vm0, %v225_v14 }
  0xcd   :  { %3005 = vmatpush3.xpose.msk.msra.mxu1 %vm340_vm0, %v257_v15  ;;  %2972 = vmatprep.subr.msk.mxu0 %vm340_vm0, %v240_v16 }
  0xce   :  { %3006 = vmatprep.subr.msk.mxu1 %vm340_vm0, %v272_v17 }
  0xd0   :  { %2973 = vmatpush3.xpose.msk.msra.mxu0 %vm340_vm0, %v224_v18 }
  0xd1   :  { %3007 = vmatpush3.xpose.msk.msra.mxu1 %vm340_vm0, %v256_v19  ;;  %2974 = vmatprep.subr.msk.mxu0 %vm340_vm0, %v239_v20 }
  0xd2   :  { %3008 = vmatprep.subr.msk.mxu1 %vm340_vm0, %v271_v21 }
  0xd4   :  { %2975 = vmatpush3.xpose.msk.msra.mxu0 %vm340_vm0, %v223_v22 }
  0xd5   :  { %3009 = vmatpush3.xpose.msk.msra.mxu1 %vm340_vm0, %v255_v23  ;;  %2976 = vmatprep.subr.msk.mxu0 %vm340_vm0, %v238_v24 }
  0xd6   :  { %3010 = vmatprep.subr.msk.mxu1 %vm340_vm0, %v270_v25 }
  0xd8   :  { %2977 = vmatpush3.xpose.msk.msra.mxu0 %vm340_vm0, %v222_v26 }
  0xd9   :  { %3011 = vmatpush3.xpose.msk.msra.mxu1 %vm340_vm0, %v254_v28  ;;  %2978 = vmatprep.subr.msk.mxu0 %vm340_vm0, %v237_v29 }
  0xda   :  { %3012 = vmatprep.subr.msk.mxu1 %vm340_vm0, %v269_v30 }
  0xdc   :  { %2979 = vmatpush3.xpose.msk.msra.mxu0 %vm340_vm0, %v221_v31 }
  0xdd   :  { %3013 = vmatpush3.xpose.msk.msra.mxu1 %vm340_vm0, %v253_v32  ;;  %2980 = vmatprep.subr.msk.mxu0 %vm340_vm0, %v236_v33 }
  0xde   :  { %3014 = vmatprep.subr.msk.mxu1 %vm340_vm0, %v268_v34 }
  0xe0   :  { %2981 = vmatpush3.xpose.msk.msra.mxu0 %vm340_vm0, %v220_v35 }
  0xe1   :  { %3015 = vmatpush3.xpose.msk.msra.mxu1 %vm340_vm0, %v252_v36  ;;  %2982 = vmatprep.subr.msk.mxu0 %vm340_vm0, %v235_v37 }
  0xe2   :  { %3016 = vmatprep.subr.msk.mxu1 %vm340_vm0, %v267_v38 }
  0xe4   :  { %2983 = vmatpush3.xpose.msk.msra.mxu0 %vm340_vm0, %v219_v39 }
  0xe5   :  { %3017 = vmatpush3.xpose.msk.msra.mxu1 %vm340_vm0, %v251_v40  ;;  %2984 = vmatprep.subr.msk.mxu0 %vm340_vm0, %v234_v41 }
  0xe6   :  { %3018 = vmatprep.subr.msk.mxu1 %vm340_vm0, %v266_v42 }
  0xe8   :  { %2985 = vmatpush3.xpose.msk.msra.mxu0 %vm340_vm0, %v218_v43 }
  0xe9   :  { %3019 = vmatpush3.xpose.msk.msra.mxu1 %vm340_vm0, %v250_v44  ;;  %2986 = vmatprep.subr.msk.mxu0 %vm340_vm0, %v233_v45 }
  0xea   :  { %3020 = vmatprep.subr.msk.mxu1 %vm340_vm0, %v265_v46 }
  0xec   :  { %2987 = vmatpush3.xpose.msk.msra.mxu0 %vm340_vm0, %v217_v47 }
  0xed   :  { %3021 = vmatpush3.xpose.msk.msra.mxu1 %vm340_vm0, %v249_v48  ;;  %2988 = vmatprep.subr.msk.mxu0 %vm340_vm0, %v232_v49 }
  0xee   :  { %3022 = vmatprep.subr.msk.mxu1 %vm340_vm0, %v264_v50 }
  0xf0   :  { %2989 = vmatpush3.xpose.msk.msra.mxu0 %vm340_vm0, %v216_v51 }
  0xf1   :  { %3023 = vmatpush3.xpose.msk.msra.mxu1 %vm340_vm0, %v248_v52  ;;  %2990 = vmatprep.subr.msk.mxu0 %vm340_vm0, %v231_v53 }
  0xf2   :  { %3024 = vmatprep.subr.msk.mxu1 %vm340_vm0, %v263_v54 }
  0xf4   :  { %2991 = vmatpush3.xpose.msk.msra.mxu0 %vm340_vm0, %v215_v55 }
  0xf5   :  { %3025 = vmatpush3.xpose.msk.msra.mxu1 %vm340_vm0, %v247_v56  ;;  %2992 = vmatprep.subr.msk.mxu0 %vm340_vm0, %v230_v57 }
  0xf6   :  { %3026 = vmatprep.subr.msk.mxu1 %vm340_vm0, %v262_v58  ;;  %v4523_v58 = vld [vmem:[%s5221_s2 + $0xf8] sm:$0xff] }
  0xf7   :  { %5292 = vst [vmem:[#allocation5_spill] sm:$0xff] %v4523_v58 }
  0xf8   :  { %2993 = vmatpush3.xpose.msk.msra.mxu0 %vm340_vm0, %v214_v59  ;;  %v4528_v59 = vld [vmem:[%s5221_s2 + $0x1f8] sm:$0xff] }
  0xf9   :  { %3027 = vmatpush3.xpose.msk.msra.mxu1 %vm340_vm0, %v246_v60  ;;  %2994 = vmatprep.subr.msk.mxu0 %vm340_vm0, %v229_v61  ;;  %5293 = vst [vmem:[#allocation6_spill] sm:$0xff] %v4528_v59  ;;  %v4533_v60 = vld [vmem:[%s5221_s2 + $0x78] sm:$0xff] }
  0xfa   :  { %3028 = vmatprep.subr.msk.mxu1 %vm340_vm0, %v261_v62  ;;  %v4540_v61 = vld [vmem:[%s5221_s2 + $0x178] sm:$0xff]  ;;  %v4545_v62 = vld [vmem:[%s5221_s2 + $0xf0] sm:$0xff] }
  0xfc   :  { %2995 = vmatpush3.xpose.msk.msra.mxu0 %vm340_vm0, %v213_v63  ;;  %v4550_v63 = vld [vmem:[%s5221_s2 + $0x1f0] sm:$0xff] }
  0xfd   :  { %3029 = vmatpush3.xpose.msk.msra.mxu1 %vm340_vm0, %v245_v0  ;;  %2996 = vmatprep.subr.msk.mxu0 %vm340_vm0, %v228_v1  ;;  %v4557_v0 = vld [vmem:[%s5221_s2 + $0x70] sm:$0xff] }
  0xfe   :  { %3030 = vmatprep.subr.msk.mxu1 %vm340_vm0, %v260_v2  ;;  %v4562_v1 = vld [vmem:[%s5221_s2 + $0x170] sm:$0xff]  ;;  %v4567_v2 = vld [vmem:[%s5221_s2 + $0xe8] sm:$0xff] }
 0x100   :  { %2997 = vmatpush3.xpose.msk.msra.mxu0 %vm340_vm0, %v212_v3  ;;  %v4574_v3 = vld [vmem:[%s5221_s2 + $0x1e8] sm:$0xff] }
 0x101   :  { %3031 = vmatpush3.xpose.msk.msra.mxu1 %vm340_vm0, %v244_v4  ;;  %3034 = vmatprep.subr.mxu0 %v4523_v58  ;;  %v4579_v4 = vld [vmem:[%s5221_s2 + $0x68] sm:$0xff] }
 0x102   :  { %3069 = vmatprep.subr.mxu1 %v4528_v59 }
 0x103   :  { %v602_v5 = vpop.f32.mrf.mxu0  ;;  %2999 = vmatmul.mubr.msk.f32.vlgmr.msra.gmra.mxu0 %vm340_vm0, %v3512_v27 }
 0x104   :  { %3033 = vmatmul.mubr.msk.f32.vlgmr.msra.gmra.mxu1 %vm340_vm0, %v3512_v27  ;;  %v673_v6 = vpop.f32.mrf.mxu1  ;;  %v1681_v7 = vsel %vm1680_vm1, %v602_v5, -inf  ;;  %3035 = vmatpush3.msra.mxu0 %v4533_v60 }
 0x105   :  { %v604_v8 = vpop.f32.mrf.mxu0  ;;  %v1684_v11 = vsel %vm1680_vm1, %v673_v6, -inf  ;;  %3070 = vmatpush3.msra.mxu1 %v4540_v61  ;;  %3036 = vmatprep.subr.mxu0 %v4545_v62 }
 0x106   :  { %v675_v9 = vpop.f32.mrf.mxu1  ;;  %v1682_v10 = vsel %vm1680_vm1, %v604_v8, -inf  ;;  %3071 = vmatprep.subr.mxu1 %v4550_v63  ;;  %3037 = vmatpush3.msra.mxu0 %v4557_v0 }
 0x107   :  { %v1683_v12 = vmax.f32 %v1681_v7, %v1682_v10  ;;  %v1686_v13 = vsel %vm1680_vm1, %v675_v9, -inf  ;;  %3072 = vmatpush3.msra.mxu1 %v4562_v1  ;;  %v4596_v7 = vld [vmem:[%s5221_s2 + $0x1e0] sm:$0xff]  ;;  %3038 = vmatprep.subr.mxu0 %v4567_v2  ;;  %v4619_v10 = vld [vmem:[%s5221_s2 + $0xd8] sm:$0xff] }
 0x108   :  { %3073 = vmatprep.subr.mxu1 %v4574_v3  ;;  %3039 = vmatpush3.msra.mxu0 %v4579_v4 }
 0x109   :  { %v1685_v14 = vmax.f32 %v1683_v12, %v1684_v11  ;;  %v4624_v11 = vld [vmem:[%s5221_s2 + $0x1d8] sm:$0xff] }
 0x10a   :  { %v4631_v12 = vld [vmem:[%s5221_s2 + $0x58] sm:$0xff] }
 0x10b   :  { %v1687_v15 = vmax.f32 %v1685_v14, %v1686_v13  ;;  %v4636_v13 = vld [vmem:[%s5221_s2 + $0x158] sm:$0xff]  ;;  %v4643_v14 = vld [vmem:[%s5221_s2 + $0xd0] sm:$0xff] }
 0x10d   :  { %1688 = vmax.xlane.f32.xlu0 %v1687_v15  ;;  %v4648_v15 = vld [vmem:[%s5221_s2 + $0x1d0] sm:$0xff] }
 0x143   :  { %v4472_v16 = vpop.f32.mrf.mxu0 }
 0x144   :  { %v4474_v17 = vpop.f32.mrf.mxu1  ;;  %v1690_v27 = vsel %vm1680_vm1, %v4472_v16, -inf }
 0x145   :  { %v4478_v18 = vpop.f32.mrf.mxu0  ;;  %v1693_v21 = vsel %vm1680_vm1, %v4474_v17, -inf }
 0x146   :  { %v4480_v19 = vpop.f32.mrf.mxu1  ;;  %v1691_v20 = vsel %vm1680_vm1, %v4478_v18, -inf }
 0x147   :  { %v1692_v22 = vmax.f32 %v1690_v27, %v1691_v20  ;;  %v1695_v23 = vsel %vm1680_vm1, %v4480_v19, -inf  ;;  %v4655_v27 = vld [vmem:[%s5221_s2 + $0x50] sm:$0xff] }
 0x148   :  { %v4660_v20 = vld [vmem:[%s5221_s2 + $0x150] sm:$0xff] }
 0x149   :  { %v1694_v24 = vmax.f32 %v1692_v22, %v1693_v21  ;;  %v4667_v21 = vld [vmem:[%s5221_s2 + $0xc8] sm:$0xff] }
 0x14a   :  { %v4672_v22 = vld [vmem:[%s5221_s2 + $0x1c8] sm:$0xff] }
 0x14b   :  { %v1696_v25 = vmax.f32 %v1694_v24, %v1695_v23  ;;  %v4679_v23 = vld [vmem:[%s5221_s2 + $0x48] sm:$0xff] }
 0x14c   :  { %v4684_v24 = vld [vmem:[%s5221_s2 + $0x148] sm:$0xff] }
 0x14d   :  { %1697 = vmax.xlane.f32.xlu0 %v1696_v25  ;;  %v4691_v25 = vld [vmem:[%s5221_s2 + $0xc0] sm:$0xff] }
 0x183   :  { %v4488_v26 = vpop.f32.mrf.mxu0 }
 0x184   :  { %v4490_v28 = vpop.f32.mrf.mxu1  ;;  %v1699_v29 = vsel %vm1680_vm1, %v4488_v26, -inf }
 0x185   :  { %v4494_v30 = vpop.f32.mrf.mxu0  ;;  %v1702_v33 = vsel %vm1680_vm1, %v4490_v28, -inf }
 0x186   :  { %v4496_v31 = vpop.f32.mrf.mxu1  ;;  %v1700_v32 = vsel %vm1680_vm1, %v4494_v30, -inf }
 0x187   :  { %v1701_v34 = vmax.f32 %v1699_v29, %v1700_v32  ;;  %v1704_v35 = vsel %vm1680_vm1, %v4496_v31, -inf  ;;  %v4696_v29 = vld [vmem:[%s5221_s2 + $0x1c0] sm:$0xff] }
 0x189   :  { %v1703_v36 = vmax.f32 %v1701_v34, %v1702_v33  ;;  %v4707_v34 = vld [vmem:[%s5221_s2 + $0x40] sm:$0xff] }
 0x18b   :  { %v1705_v37 = vmax.f32 %v1703_v36, %v1704_v35  ;;  %v4712_v35 = vld [vmem:[%s5221_s2 + $0x140] sm:$0xff]  ;;  %v4719_v36 = vld [vmem:[%s5221_s2 + $0xb8] sm:$0xff] }
 0x18d   :  { %1706 = vmax.xlane.f32.xlu1 %v1705_v37  ;;  %v4724_v37 = vld [vmem:[%s5221_s2 + $0x1b8] sm:$0xff] }
 0x196   :  { %v1689_v38 = vpop.xlane.xlu0 %1688 }
 0x197   :  { %v1717_v39 = vsub.f32 %v602_v5, %v1689_v38  ;;  %v1718_v40 = vsub.f32 %v604_v8, %v1689_v38  ;;  %v1719_v41 = vsub.f32 %v673_v6, %v1689_v38  ;;  %v1720_v42 = vsub.f32 %v675_v9, %v1689_v38  ;;  %v4584_v5 = vld [vmem:[%s5221_s2 + $0x168] sm:$0xff]  ;;  %v4591_v6 = vld [vmem:[%s5221_s2 + $0xe0] sm:$0xff] }
 0x198   :  { %v4603_v8 = vld [vmem:[%s5221_s2 + $0x60] sm:$0xff]  ;;  %3074 = vmatpush3.msra.mxu1 %v4584_v5  ;;  %3040 = vmatprep.subr.mxu0 %v4591_v6 }
 0x199   :  { %v1733_v43 = vmul.f32 1.442695, %v1717_v39  ;;  %v1735_v44 = vmul.f32 1.442695, %v1718_v40  ;;  %v1737_v45 = vmul.f32 1.442695, %v1719_v41  ;;  %3075 = vmatprep.subr.mxu1 %v4596_v7  ;;  %3041 = vmatpush3.msra.mxu0 %v4603_v8 }
 0x19a   :  { %v1739_v46 = vmul.f32 1.442695, %v1720_v42  ;;  %v4608_v9 = vld [vmem:[%s5221_s2 + $0x160] sm:$0xff]  ;;  %3042 = vmatprep.subr.mxu0 %v4619_v10  ;;  %v4733_v39 = vld [vmem:[%s5221_s2 + $0x38] sm:$0xff] }
 0x19b   :  { %3317 = vpow2.f32 %v1733_v43  ;;  %3076 = vmatpush3.msra.mxu1 %v4608_v9  ;;  %3043 = vmatpush3.msra.mxu0 %v4631_v12  ;;  %v4738_v40 = vld [vmem:[%s5221_s2 + $0x138] sm:$0xff] }
 0x19c   :  { %3319 = vpow2.f32 %v1735_v44  ;;  %3077 = vmatprep.subr.mxu1 %v4624_v11  ;;  %3044 = vmatprep.subr.mxu0 %v4643_v14  ;;  %v4751_v44 = vld [vmem:[%s5221_s2 + $0xb0] sm:$0xff] }
 0x19d   :  { %3321 = vpow2.f32 %v1737_v45  ;;  %3078 = vmatpush3.msra.mxu1 %v4636_v13  ;;  %3045 = vmatpush3.msra.mxu0 %v4655_v27  ;;  %v4756_v45 = vld [vmem:[%s5221_s2 + $0x1b0] sm:$0xff] }
 0x19e   :  { %3323 = vpow2.f32 %v1739_v46  ;;  %3079 = vmatprep.subr.mxu1 %v4648_v15  ;;  %3046 = vmatprep.subr.mxu0 %v4667_v21  ;;  %5294 = vst [vmem:[#allocation7_spill] sm:$0xff] %v4756_v45 }
 0x19f   :  { %3080 = vmatpush3.msra.mxu1 %v4660_v20  ;;  %3047 = vmatpush3.msra.mxu0 %v4679_v23 }
 0x1a0   :  { %3081 = vmatprep.subr.mxu1 %v4672_v22  ;;  %3048 = vmatprep.subr.mxu0 %v4691_v25 }
 0x1a1   :  { %3082 = vmatpush3.msra.mxu1 %v4684_v24  ;;  %3049 = vmatpush3.msra.mxu0 %v4707_v34 }
 0x1a2   :  { %3083 = vmatprep.subr.mxu1 %v4696_v29  ;;  %3050 = vmatprep.subr.mxu0 %v4719_v36 }
 0x1a3   :  { %3084 = vmatpush3.msra.mxu1 %v4712_v35  ;;  %3051 = vmatpush3.msra.mxu0 %v4733_v39 }
 0x1a4   :  { %3085 = vmatprep.subr.mxu1 %v4724_v37  ;;  %3052 = vmatprep.subr.mxu0 %v4751_v44 }
 0x1a5   :  { %3086 = vmatpush3.msra.mxu1 %v4738_v40 }
 0x1a6   :  { %3087 = vmatprep.subr.mxu1 %v4756_v45 }
 0x1a8   :  { %v4504_v47 = vpop.eup %3317 }
 0x1a9   :  { %v4506_v48 = vpop.eup %3319  ;;  %v1765_v49 = vsel %vm1680_vm1, %v4504_v47, 0.0 }
 0x1aa   :  { %v4510_v50 = vpop.eup %3321  ;;  %v1766_v51 = vsel %vm1680_vm1, %v4506_v48, 0.0 }
 0x1ab   :  { %v4514_v52 = vpop.eup %3323  ;;  %v1767_v53 = vadd.f32 %v1766_v51, %v1765_v49  ;;  %v1768_v54 = vsel %vm1680_vm1, %v4510_v50, 0.0  ;;  %v4765_v51 = vld [vmem:[%s5221_s2 + $0x30] sm:$0xff] }
 0x1ac   :  { %v1770_v56 = vsel %vm1680_vm1, %v4514_v52, 0.0  ;;  %5295 = vst [vmem:[#allocation8_spill] sm:$0xff] %v4765_v51  ;;  %3053 = vmatpush3.msra.mxu0 %v4765_v51  ;;  %v4835_v51 = vld [vmem:[%s5221_s2 + $0x18] sm:$0xff] }
 0x1ad   :  { %v1769_v55 = vadd.f32 %v1768_v54, %v1767_v53  ;;  %v4770_v53 = vld [vmem:[%s5221_s2 + $0x130] sm:$0xff]  ;;  %v4777_v54 = vld [vmem:[%s5221_s2 + $0xa8] sm:$0xff]  ;;  %5307 = vst [vmem:[#allocation20_spill] sm:$0xff] %v4835_v51 }
 0x1ae   :  { %5296 = vst [vmem:[#allocation9_spill] sm:$0xff] %v4770_v53  ;;  %3088 = vmatpush3.msra.mxu1 %v4770_v53  ;;  %5297 = vst [vmem:[#allocation10_spill] sm:$0xff] %v4777_v54  ;;  %3054 = vmatprep.subr.mxu0 %v4777_v54  ;;  %v4818_v54 = vld [vmem:[%s5221_s2 + $0x120] sm:$0xff] }
 0x1af   :  { %v1771_v57 = vadd.f32 %v1770_v56, %v1769_v55  ;;  %v4782_v55 = vld [vmem:[%s5221_s2 + $0x1a8] sm:$0xff]  ;;  %5304 = vst [vmem:[#allocation17_spill] sm:$0xff] %v4818_v54 }
 0x1b0   :  { %5298 = vst [vmem:[#allocation11_spill] sm:$0xff] %v4782_v55  ;;  %3089 = vmatprep.subr.mxu1 %v4782_v55  ;;  %v4813_v55 = vld [vmem:[%s5221_s2 + $0x20] sm:$0xff] }
 0x1b1   :  { %1772 = vadd.xlane.f32.xlu0 %v1771_v57  ;;  %v4789_v57 = vld [vmem:[%s5221_s2 + $0x28] sm:$0xff]  ;;  %5303 = vst [vmem:[#allocation16_spill] sm:$0xff] %v4813_v55 }
 0x1b2   :  { %5299 = vst [vmem:[#allocation12_spill] sm:$0xff] %v4789_v57  ;;  %3055 = vmatpush3.msra.mxu0 %v4789_v57  ;;  %v4830_v57 = vld [vmem:[%s5221_s2 + $0x198] sm:$0xff] }
 0x1b3   :  { %5306 = vst [vmem:[#allocation19_spill] sm:$0xff] %v4830_v57 }
 0x1c3   :  { %v4698_v32 = vpop.f32.mrf.mxu0 }
 0x1c4   :  { %v4700_v33 = vpop.f32.mrf.mxu1  ;;  %v1708_v41 = vsel %vm1680_vm1, %v4698_v32, -inf }
 0x1c5   :  { %v4726_v38 = vpop.f32.mrf.mxu0  ;;  %v1711_v43 = vsel %vm1680_vm1, %v4700_v33, -inf }
 0x1c6   :  { %v1709_v42 = vsel %vm1680_vm1, %v4726_v38, -inf  ;;  %v4758_v49 = vpop.f32.mrf.mxu1 }
 0x1c7   :  { %v1710_v46 = vmax.f32 %v1708_v41, %v1709_v42  ;;  %v4794_v41 = vld [vmem:[%s5221_s2 + $0x128] sm:$0xff]  ;;  %v4799_v42 = vld [vmem:[%s5221_s2 + $0xa0] sm:$0xff] }
 0x1c8   :  { %5300 = vst [vmem:[#allocation13_spill] sm:$0xff] %v4794_v41  ;;  %5301 = vst [vmem:[#allocation14_spill] sm:$0xff] %v4799_v42  ;;  %3090 = vmatpush3.msra.mxu1 %v4794_v41  ;;  %3056 = vmatprep.subr.mxu0 %v4799_v42  ;;  %v4825_v41 = vld [vmem:[%s5221_s2 + $0x98] sm:$0xff] }
 0x1c9   :  { %v1712_v56 = vmax.f32 %v1710_v46, %v1711_v43  ;;  %v1713_v43 = vsel %vm1680_vm1, %v4758_v49, -inf  ;;  %v4808_v46 = vld [vmem:[%s5221_s2 + $0x1a0] sm:$0xff]  ;;  %5305 = vst [vmem:[#allocation18_spill] sm:$0xff] %v4825_v41  ;;  %3057 = vmatpush3.msra.mxu0 %v4813_v55 }
 0x1ca   :  { %5302 = vst [vmem:[#allocation15_spill] sm:$0xff] %v4808_v46  ;;  %3091 = vmatprep.subr.mxu1 %v4808_v46  ;;  %3058 = vmatprep.subr.mxu0 %v4825_v41  ;;  %v4853_v46 = vld [vmem:[%s5221_s2 + $0x190] sm:$0xff]  ;;  %v4870_v41 = vld [vmem:[%s5221_s2 + $0x88] sm:$0xff] }
 0x1cb   :  { %v1714_v53 = vmax.f32 %v1712_v56, %v1713_v43  ;;  %3092 = vmatpush3.msra.mxu1 %v4818_v54  ;;  %v4842_v56 = vld [vmem:[%s5221_s2 + $0x118] sm:$0xff]  ;;  %v4847_v43 = vld [vmem:[%s5221_s2 + $0x90] sm:$0xff]  ;;  %5310 = vst [vmem:[#allocation23_spill] sm:$0xff] %v4853_v46  ;;  %3059 = vmatpush3.msra.mxu0 %v4835_v51  ;;  %5313 = vst [vmem:[#allocation26_spill] sm:$0xff] %v4870_v41 }
 0x1cc   :  { %5308 = vst [vmem:[#allocation21_spill] sm:$0xff] %v4842_v56  ;;  %5309 = vst [vmem:[#allocation22_spill] sm:$0xff] %v4847_v43  ;;  %v4858_v54 = vld [vmem:[%s5221_s2 + $0x10] sm:$0xff]  ;;  %3093 = vmatprep.subr.mxu1 %v4830_v57  ;;  %3060 = vmatprep.subr.mxu0 %v4847_v43  ;;  %v4877_v57 = vld [vmem:[%s5221_s2 + $0x188] sm:$0xff] }
 0x1cd   :  { %1715 = vmax.xlane.f32.xlu1 %v1714_v53  ;;  %5311 = vst [vmem:[#allocation24_spill] sm:$0xff] %v4858_v54  ;;  %v4865_v53 = vld [vmem:[%s5221_s2 + $0x110] sm:$0xff]  ;;  %3094 = vmatpush3.msra.mxu1 %v4842_v56  ;;  %5314 = vst [vmem:[#allocation27_spill] sm:$0xff] %v4877_v57  ;;  %v4882_v51 = vld [vmem:[%s5221_s2 + $0x8] sm:$0xff] }
 0x1ce   :  { %5312 = vst [vmem:[#allocation25_spill] sm:$0xff] %v4865_v53  ;;  %5315 = vst [vmem:[#allocation28_spill] sm:$0xff] %v4882_v51  ;;  %3095 = vmatprep.subr.mxu1 %v4853_v46  ;;  %3061 = vmatpush3.msra.mxu0 %v4858_v54  ;;  %v4889_v56 = vld [vmem:[%s5221_s2 + $0x108] sm:$0xff]  ;;  %v4894_v43 = vld [vmem:[%s5221_s2 + $0x80] sm:$0xff] }
 0x1cf   :  { %5316 = vst [vmem:[#allocation29_spill] sm:$0xff] %v4889_v56  ;;  %5317 = vst [vmem:[#allocation30_spill] sm:$0xff] %v4894_v43  ;;  %3096 = vmatpush3.msra.mxu1 %v4865_v53  ;;  %3062 = vmatprep.subr.mxu0 %v4870_v41  ;;  %v4901_v46 = vld [vmem:[%s5221_s2 + $0x180] sm:$0xff] }
 0x1d0   :  { %5318 = vst [vmem:[#allocation31_spill] sm:$0xff] %v4901_v46  ;;  %v4906_v54 = vld [vmem:[%s5221_s2] sm:$0xff]  ;;  %3097 = vmatprep.subr.mxu1 %v4877_v57  ;;  %3063 = vmatpush3.msra.mxu0 %v4882_v51 }
 0x1d1   :  { %5319 = vst [vmem:[#allocation32_spill] sm:$0xff] %v4906_v54  ;;  %v4913_v53 = vld [vmem:[%s5221_s2 + $0x100] sm:$0xff]  ;;  %3098 = vmatpush3.msra.mxu1 %v4889_v56  ;;  %3064 = vmatprep.subr.mxu0 %v4894_v43 }
 0x1d2   :  { %5320 = vst [vmem:[#allocation33_spill] sm:$0xff] %v4913_v53  ;;  %3099 = vmatprep.subr.mxu1 %v4901_v46  ;;  %3065 = vmatpush3.msra.mxu0 %v4906_v54 }
 0x1d3   :  { %3100 = vmatpush3.msra.mxu1 %v4913_v53  ;;  %3104 = vmatprep.subr.mxu0 %v4523_v58 }
 0x1d4   :  { %3139 = vmatprep.subr.mxu1 %v4528_v59 }
 0x1d6   :  { %v1698_v57 = vpop.xlane.xlu0 %1697 }
 0x1d7   :  { %v1721_v51 = vsub.f32 %v4472_v16, %v1698_v57  ;;  %v1722_v41 = vsub.f32 %v4478_v18, %v1698_v57  ;;  %v1723_v55 = vsub.f32 %v4474_v17, %v1698_v57  ;;  %v1724_v56 = vsub.f32 %v4480_v19, %v1698_v57 }
 0x1d9   :  { %v1741_v43 = vmul.f32 1.442695, %v1721_v51  ;;  %v1743_v42 = vmul.f32 1.442695, %v1722_v41  ;;  %v1745_v46 = vmul.f32 1.442695, %v1723_v55 }
 0x1da   :  { %v1747_v45 = vmul.f32 1.442695, %v1724_v56 }
 0x1db   :  { %3325 = vpow2.f32 %v1741_v43 }
 0x1dc   :  { %3327 = vpow2.f32 %v1743_v42 }
 0x1dd   :  { %3329 = vpow2.f32 %v1745_v46 }
 0x1de   :  { %3331 = vpow2.f32 %v1747_v45 }
 0x1e8   :  { %v4926_v58 = vpop.eup %3325 }
 0x1e9   :  { %5321 = vst [vmem:[#allocation34_spill] sm:$0xff] %v4926_v58  ;;  %v4928_v53 = vpop.eup %3327  ;;  %v1774_v16 = vsel %vm1680_vm1, %v4926_v58, 0.0 }
 0x1ea   :  { %5322 = vst [vmem:[#allocation35_spill] sm:$0xff] %v4928_v53  ;;  %v4932_v18 = vpop.eup %3329  ;;  %v1775_v17 = vsel %vm1680_vm1, %v4928_v53, 0.0 }
 0x1eb   :  { %v4936_v19 = vpop.eup %3331  ;;  %v1776_v51 = vadd.f32 %v1775_v17, %v1774_v16  ;;  %v1777_v55 = vsel %vm1680_vm1, %v4932_v18, 0.0 }
 0x1ec   :  { %v1779_v45 = vsel %vm1680_vm1, %v4936_v19, 0.0 }
 0x1ed   :  { %v1778_v57 = vadd.f32 %v1777_v55, %v1776_v51 }
 0x1ef   :  { %v1780_v41 = vadd.f32 %v1779_v45, %v1778_v57 }
 0x1f1   :  { %1781 = vadd.xlane.f32.xlu1 %v1780_v41 }
 0x216   :  { %v1707_v42 = vpop.xlane.xlu1 %1706 }
 0x217   :  { %v1725_v46 = vsub.f32 %v4488_v26, %v1707_v42  ;;  %v1726_v56 = vsub.f32 %v4494_v30, %v1707_v42  ;;  %v1727_v43 = vsub.f32 %v4490_v28, %v1707_v42  ;;  %v1728_v53 = vsub.f32 %v4496_v31, %v1707_v42 }
 0x219   :  { %v1749_v58 = vmul.f32 1.442695, %v1725_v46  ;;  %v1751_v16 = vmul.f32 1.442695, %v1726_v56  ;;  %v1753_v17 = vmul.f32 1.442695, %v1727_v43 }
 0x21a   :  { %v1755_v59 = vmul.f32 1.442695, %v1728_v53  ;;  %v1813_v56 = vld [vmem:[%s5222_s3] sm:$0xff]  ;;  %v1814_v43 = vld [vmem:[%s5222_s3 + $0x8] sm:$0xff] }
 0x21b   :  { %3333 = vpow2.f32 %v1749_v58  ;;  %vm1821_vm2 = vcmp.ge.f32.partialorder %v1813_v56, 0.1  ;;  %vm1822_vm3 = vcmp.ge.f32.partialorder %v1814_v43, 0.1 }
 0x21c   :  { %3335 = vpow2.f32 %v1751_v16 }
 0x21d   :  { %3337 = vpow2.f32 %v1753_v17 }
 0x21e   :  { %3339 = vpow2.f32 %v1755_v59 }
 0x228   :  { %v4946_v51 = vpop.eup %3333 }
 0x229   :  { %5323 = vst [vmem:[#allocation36_spill] sm:$0xff] %v4946_v51  ;;  %v4948_v55 = vpop.eup %3335  ;;  %v1783_v26 = vsel %vm1680_vm1, %v4946_v51, 0.0  ;;  %v5349_v51 = vld [vmem:[#allocation25_spill] sm:$0xff] }
 0x22a   :  { %5324 = vst [vmem:[#allocation37_spill] sm:$0xff] %v4948_v55  ;;  %v4952_v30 = vpop.eup %3337  ;;  %v1784_v28 = vsel %vm1680_vm1, %v4948_v55, 0.0 }
 0x22b   :  { %5325 = vst [vmem:[#allocation38_spill] sm:$0xff] %v4952_v30  ;;  %v4956_v31 = vpop.eup %3339  ;;  %v1785_v57 = vadd.f32 %v1784_v28, %v1783_v26  ;;  %v1786_v58 = vsel %vm1680_vm1, %v4952_v30, 0.0 }
 0x22c   :  { %5326 = vst [vmem:[#allocation39_spill] sm:$0xff] %v4956_v31  ;;  %v1788_v59 = vsel %vm1680_vm1, %v4956_v31, 0.0  ;;  %v5346_v31 = vld [vmem:[#allocation22_spill] sm:$0xff] }
 0x22d   :  { %v1787_v53 = vadd.f32 %v1786_v58, %v1785_v57 }
 0x22f   :  { %v1789_v45 = vadd.f32 %v1788_v59, %v1787_v53 }
 0x231   :  { %1790 = vadd.xlane.f32.xlu0 %v1789_v45 }
 0x23a   :  { %v1773_v41 = vpop.xlane.xlu0 %1772 }
 0x23b   :  { %3341 = vrcp.f32 %v1773_v41 }
 0x248   :  { %v3342_v42 = vpop.eup %3341 }
 0x249   :  { %v1809_v46 = vmul.f32 1.1111112, %v3342_v42 }
 0x24b   :  { %v1829_v16 = vmul.f32 %v4504_v47, %v1809_v46  ;;  %v1830_v17 = vmul.f32 %v4506_v48, %v1809_v46  ;;  %v1831_v26 = vmul.f32 %v4510_v50, %v1809_v46  ;;  %v1832_v28 = vmul.f32 %v4514_v52, %v1809_v46 }
 0x24d   :  { %v1861_v57 = vcombine.low %v1829_v16, %v1830_v17  ;;  %v1862_v58 = vcombine.low %v1831_v26, %v1832_v28  ;;  %v5330_v16 = vld [vmem:[#allocation10_spill] sm:$0xff]  ;;  %v5332_v26 = vld [vmem:[#allocation11_spill] sm:$0xff]  ;;  %v5333_v28 = vld [vmem:[#allocation12_spill] sm:$0xff] }
 0x24f   :  { %v1877_v53 = vsel %vm1821_vm2, %v1861_v57, 0.0  ;;  %v1878_v59 = vsel %vm1822_vm3, %v1862_v58, 0.0 }
 0x250   :  { %v1887_v45 = vcombine.high %v1877_v53, %v1877_v53  ;;  %v1888_v41 = vcombine.high %v1878_v59, %v1878_v59  ;;  %v5335_v53 = vld [vmem:[#allocation13_spill] sm:$0xff]  ;;  %v5336_v59 = vld [vmem:[#allocation14_spill] sm:$0xff] }
 0x252   :  { %1955 = vmatprep.mubr.f32.mxu0 %v1887_v45  ;;  %2025 = vmatprep.mubr.f32.mxu1 %v1888_v41 }
 0x253   :  { %2754 = vmatmul.mubr.msk.f32.vlgmr.msra.gmra.mxu0 %vm1821_vm2, %v1861_v57  ;;  %2755 = vmatmul.mubr.msk.f32.vlgmr.msra.gmra.mxu1 %vm1822_vm3, %v1862_v58 }
 0x254   :  { %3105 = vmatpush3.msra.mxu0 %v4533_v60  ;;  %3140 = vmatpush3.msra.mxu1 %v4540_v61 }
 0x255   :  { %3106 = vmatprep.subr.mxu0 %v4545_v62  ;;  %3141 = vmatprep.subr.mxu1 %v4550_v63 }
 0x256   :  { %v1716_v47 = vpop.xlane.xlu1 %1715  ;;  %3107 = vmatpush3.msra.mxu0 %v4557_v0  ;;  %3142 = vmatpush3.msra.mxu1 %v4562_v1 }
 0x257   :  { %v1729_v48 = vsub.f32 %v4698_v32, %v1716_v47  ;;  %v1730_v50 = vsub.f32 %v4726_v38, %v1716_v47  ;;  %v1731_v52 = vsub.f32 %v4700_v33, %v1716_v47  ;;  %v1732_v42 = vsub.f32 %v4758_v49, %v1716_v47  ;;  %3108 = vmatprep.subr.mxu0 %v4567_v2  ;;  %v5327_v33 = vld [vmem:[#allocation7_spill] sm:$0xff]  ;;  %v5328_v38 = vld [vmem:[#allocation8_spill] sm:$0xff]  ;;  %v5329_v49 = vld [vmem:[#allocation9_spill] sm:$0xff] }
 0x258   :  { %3143 = vmatprep.subr.mxu1 %v4574_v3  ;;  %3109 = vmatpush3.msra.mxu0 %v4579_v4  ;;  %v5338_v47 = vld [vmem:[#allocation15_spill] sm:$0xff] }
 0x259   :  { %v1757_v46 = vmul.f32 1.442695, %v1729_v48  ;;  %v1759_v56 = vmul.f32 1.442695, %v1730_v50  ;;  %v1761_v43 = vmul.f32 1.442695, %v1731_v52  ;;  %3144 = vmatpush3.msra.mxu1 %v4584_v5  ;;  %3110 = vmatprep.subr.mxu0 %v4591_v6 }
 0x25a   :  { %v1763_v32 = vmul.f32 1.442695, %v1732_v42  ;;  %3145 = vmatprep.subr.mxu1 %v4596_v7  ;;  %3111 = vmatpush3.msra.mxu0 %v4603_v8  ;;  %v5339_v48 = vld [vmem:[#allocation16_spill] sm:$0xff]  ;;  %v5341_v42 = vld [vmem:[#allocation17_spill] sm:$0xff] }
 0x25b   :  { %3343 = vpow2.f32 %v1757_v46  ;;  %3146 = vmatpush3.msra.mxu1 %v4608_v9  ;;  %3112 = vmatprep.subr.mxu0 %v4619_v10  ;;  %v5342_v46 = vld [vmem:[#allocation18_spill] sm:$0xff] }
 0x25c   :  { %3345 = vpow2.f32 %v1759_v56  ;;  %3147 = vmatprep.subr.mxu1 %v4624_v11  ;;  %3113 = vmatpush3.msra.mxu0 %v4631_v12 }
 0x25d   :  { %3347 = vpow2.f32 %v1761_v43  ;;  %3148 = vmatpush3.msra.mxu1 %v4636_v13  ;;  %3114 = vmatprep.subr.mxu0 %v4643_v14  ;;  %v5343_v43 = vld [vmem:[#allocation19_spill] sm:$0xff] }
 0x25e   :  { %3349 = vpow2.f32 %v1763_v32  ;;  %3149 = vmatprep.subr.mxu1 %v4648_v15  ;;  %3115 = vmatpush3.msra.mxu0 %v4655_v27  ;;  %v5344_v32 = vld [vmem:[#allocation20_spill] sm:$0xff] }
 0x25f   :  { %3150 = vmatpush3.msra.mxu1 %v4660_v20  ;;  %3116 = vmatprep.subr.mxu0 %v4667_v21 }
 0x260   :  { %3151 = vmatprep.subr.mxu1 %v4672_v22  ;;  %3117 = vmatpush3.msra.mxu0 %v4679_v23 }
 0x261   :  { %3152 = vmatpush3.msra.mxu1 %v4684_v24  ;;  %3118 = vmatprep.subr.mxu0 %v4691_v25 }
 0x262   :  { %3153 = vmatprep.subr.mxu1 %v4696_v29  ;;  %3119 = vmatpush3.msra.mxu0 %v4707_v34 }
 0x263   :  { %3154 = vmatpush3.msra.mxu1 %v4712_v35  ;;  %3120 = vmatprep.subr.mxu0 %v4719_v36 }
 0x264   :  { %3155 = vmatprep.subr.mxu1 %v4724_v37  ;;  %3121 = vmatpush3.msra.mxu0 %v4733_v39 }
 0x265   :  { %3156 = vmatpush3.msra.mxu1 %v4738_v40  ;;  %3122 = vmatprep.subr.mxu0 %v4751_v44 }
 0x266   :  { %3157 = vmatprep.subr.mxu1 %v5327_v33  ;;  %3123 = vmatpush3.msra.mxu0 %v5328_v38 }
 0x267   :  { %3158 = vmatpush3.msra.mxu1 %v5329_v49  ;;  %3124 = vmatprep.subr.mxu0 %v5330_v16 }
 0x268   :  { %v5015_v17 = vpop.eup %3343  ;;  %3159 = vmatprep.subr.mxu1 %v5332_v26  ;;  %3125 = vmatpush3.msra.mxu0 %v5333_v28 }
 0x269   :  { %5331 = vst [vmem:[#allocation7_spill] sm:$0xff] %v5015_v17  ;;  %v5019_v57 = vpop.eup %3345  ;;  %v1792_v58 = vsel %vm1680_vm1, %v5015_v17, 0.0  ;;  %3160 = vmatpush3.msra.mxu1 %v5335_v53  ;;  %3126 = vmatprep.subr.mxu0 %v5336_v59 }
 0x26a   :  { %5334 = vst [vmem:[#allocation8_spill] sm:$0xff] %v5019_v57  ;;  %v5025_v45 = vpop.eup %3347  ;;  %v1793_v41 = vsel %vm1680_vm1, %v5019_v57, 0.0  ;;  %3161 = vmatprep.subr.mxu1 %v5338_v47  ;;  %3127 = vmatpush3.msra.mxu0 %v5339_v48  ;;  %v5345_v57 = vld [vmem:[#allocation21_spill] sm:$0xff] }
 0x26b   :  { %5337 = vst [vmem:[#allocation9_spill] sm:$0xff] %v5025_v45  ;;  %v5031_v50 = vpop.eup %3349  ;;  %v1794_v52 = vadd.f32 %v1793_v41, %v1792_v58  ;;  %3162 = vmatpush3.msra.mxu1 %v5341_v42  ;;  %3128 = vmatprep.subr.mxu0 %v5342_v46  ;;  %v1795_v56 = vsel %vm1680_vm1, %v5025_v45, 0.0  ;;  %v5347_v58 = vld [vmem:[#allocation23_spill] sm:$0xff]  ;;  %v5348_v41 = vld [vmem:[#allocation24_spill] sm:$0xff]  ;;  %v5350_v45 = vld [vmem:[#allocation26_spill] sm:$0xff] }
 0x26c   :  { %5340 = vst [vmem:[#allocation10_spill] sm:$0xff] %v5031_v50  ;;  %3163 = vmatprep.subr.mxu1 %v5343_v43  ;;  %3129 = vmatpush3.msra.mxu0 %v5344_v32  ;;  %v1797_v30 = vsel %vm1680_vm1, %v5031_v50, 0.0  ;;  %v5351_v43 = vld [vmem:[#allocation27_spill] sm:$0xff]  ;;  %v5352_v32 = vld [vmem:[#allocation28_spill] sm:$0xff]  ;;  %v5356_v50 = vld [vmem:[#allocation33_spill] sm:$0xff] }
 0x26d   :  { %v1796_v17 = vadd.f32 %v1795_v56, %v1794_v52  ;;  %3164 = vmatpush3.msra.mxu1 %v5345_v57  ;;  %3130 = vmatprep.subr.mxu0 %v5346_v31  ;;  %v5353_v52 = vld [vmem:[#allocation29_spill] sm:$0xff]  ;;  %v5354_v56 = vld [vmem:[#allocation30_spill] sm:$0xff]  ;;  %v5355_v31 = vld [vmem:[#allocation31_spill] sm:$0xff] }
 0x26e   :  { %3165 = vmatprep.subr.mxu1 %v5347_v58  ;;  %3131 = vmatpush3.msra.mxu0 %v5348_v41 }
 0x26f   :  { %v1798_v55 = vadd.f32 %v1797_v30, %v1796_v17  ;;  %3166 = vmatpush3.msra.mxu1 %v5349_v51  ;;  %3132 = vmatprep.subr.mxu0 %v5350_v45  ;;  %v5357_v30 = vld [vmem:[#allocation5_spill] sm:$0xff]  ;;  %v5358_v17 = vld [vmem:[#allocation6_spill] sm:$0xff] }
 0x270   :  { %3167 = vmatprep.subr.mxu1 %v5351_v43  ;;  %3133 = vmatpush3.msra.mxu0 %v5352_v32 }
 0x271   :  { %1799 = vadd.xlane.f32.xlu1 %v1798_v55  ;;  %3168 = vmatpush3.msra.mxu1 %v5353_v52  ;;  %v1815_v55 = vld [vmem:[%s5222_s3 + $0x10] sm:$0xff]  ;;  %v5360_v52 = vld [vmem:[#allocation35_spill] sm:$0xff] }
 0x272   :  { %3134 = vmatprep.subr.mxu0 %v5354_v56  ;;  %3169 = vmatprep.subr.mxu1 %v5355_v31  ;;  %v1816_v31 = vld [vmem:[%s5222_s3 + $0x18] sm:$0xff]  ;;  %vm1823_vm4 = vcmp.ge.f32.partialorder %v1815_v55, 0.1  ;;  %v5375_v55 = vld [vmem:[#allocation33_spill] sm:$0xff] }
 0x273   :  { %3135 = vmatpush3.msra.mxu0 %v4906_v54  ;;  %3170 = vmatpush3.msra.mxu1 %v5356_v50  ;;  %v5359_v56 = vld [vmem:[#allocation34_spill] sm:$0xff]  ;;  %vm1824_vm5 = vcmp.ge.f32.partialorder %v1816_v31, 0.1  ;;  %v5365_v31 = vld [vmem:[#allocation23_spill] sm:$0xff] }
 0x274   :  { %3174 = vmatprep.subr.mxu0 %v5357_v30  ;;  %3209 = vmatprep.subr.mxu1 %v5358_v17 }
 0x27a   :  { %v1782_v45 = vpop.xlane.xlu1 %1781 }
 0x27b   :  { %3351 = vrcp.f32 %v1782_v45 }
 0x288   :  { %v3352_v43 = vpop.eup %3351 }
 0x289   :  { %v1810_v51 = vmul.f32 1.1111112, %v3352_v43 }
 0x28b   :  { %v1833_v54 = vmul.f32 %v5359_v56, %v1810_v51  ;;  %v1834_v50 = vmul.f32 %v5360_v52, %v1810_v51  ;;  %v1835_v30 = vmul.f32 %v4932_v18, %v1810_v51  ;;  %v1836_v17 = vmul.f32 %v4936_v19, %v1810_v51  ;;  %v5362_v18 = vld [vmem:[#allocation20_spill] sm:$0xff]  ;;  %v5363_v19 = vld [vmem:[#allocation21_spill] sm:$0xff]  ;;  %v5364_v51 = vld [vmem:[#allocation22_spill] sm:$0xff] }
 0x28c   :  { %v5371_v52 = vld [vmem:[#allocation29_spill] sm:$0xff]  ;;  %v5372_v56 = vld [vmem:[#allocation30_spill] sm:$0xff] }
 0x28d   :  { %v1863_v45 = vcombine.low %v1833_v54, %v1834_v50  ;;  %v1864_v43 = vcombine.low %v1835_v30, %v1836_v17  ;;  %v5361_v54 = vld [vmem:[#allocation19_spill] sm:$0xff]  ;;  %v5367_v50 = vld [vmem:[#allocation25_spill] sm:$0xff]  ;;  %v5374_v17 = vld [vmem:[#allocation32_spill] sm:$0xff] }
 0x28e   :  { %v5373_v30 = vld [vmem:[#allocation31_spill] sm:$0xff] }
 0x28f   :  { %v1879_v32 = vsel %vm1823_vm4, %v1863_v45, 0.0  ;;  %v1880_v41 = vsel %vm1824_vm5, %v1864_v43, 0.0 }
 0x290   :  { %v2033_v58 = vcombine.high %v1879_v32, %v1879_v32  ;;  %v2034_v57 = vcombine.high %v1880_v41, %v1880_v41  ;;  %v5368_v32 = vld [vmem:[#allocation26_spill] sm:$0xff]  ;;  %v5370_v41 = vld [vmem:[#allocation28_spill] sm:$0xff] }
 0x292   :  { %2101 = vmatprep.mubr.f32.mxu0 %v2033_v58  ;;  %2171 = vmatprep.mubr.f32.mxu1 %v2034_v57  ;;  %v5366_v57 = vld [vmem:[#allocation24_spill] sm:$0xff]  ;;  %v5369_v58 = vld [vmem:[#allocation27_spill] sm:$0xff] }
 0x293   :  { %2756 = vmatmul.mubr.msk.f32.vlgmr.msra.gmra.mxu0 %vm1823_vm4, %v1863_v45  ;;  %2757 = vmatmul.mubr.msk.f32.vlgmr.msra.gmra.mxu1 %vm1824_vm5, %v1864_v43  ;;  %v5376_v45 = vld [vmem:[#allocation5_spill] sm:$0xff]  ;;  %v5377_v43 = vld [vmem:[#allocation6_spill] sm:$0xff] }
 0x294   :  { %3175 = vmatpush3.msra.mxu0 %v4533_v60  ;;  %3210 = vmatpush3.msra.mxu1 %v4540_v61 }
 0x295   :  { %3176 = vmatprep.subr.mxu0 %v4545_v62  ;;  %3211 = vmatprep.subr.mxu1 %v4550_v63 }
 0x296   :  { %3177 = vmatpush3.msra.mxu0 %v4557_v0  ;;  %3212 = vmatpush3.msra.mxu1 %v4562_v1 }
 0x297   :  { %3178 = vmatprep.subr.mxu0 %v4567_v2  ;;  %3213 = vmatprep.subr.mxu1 %v4574_v3 }
 0x298   :  { %3179 = vmatpush3.msra.mxu0 %v4579_v4  ;;  %3214 = vmatpush3.msra.mxu1 %v4584_v5 }
 0x299   :  { %3180 = vmatprep.subr.mxu0 %v4591_v6  ;;  %3215 = vmatprep.subr.mxu1 %v4596_v7 }
 0x29a   :  { %3181 = vmatpush3.msra.mxu0 %v4603_v8  ;;  %3216 = vmatpush3.msra.mxu1 %v4608_v9 }
 0x29b   :  { %3182 = vmatprep.subr.mxu0 %v4619_v10  ;;  %3217 = vmatprep.subr.mxu1 %v4624_v11 }
 0x29c   :  { %3183 = vmatpush3.msra.mxu0 %v4631_v12  ;;  %3218 = vmatpush3.msra.mxu1 %v4636_v13 }
 0x29d   :  { %3184 = vmatprep.subr.mxu0 %v4643_v14  ;;  %3219 = vmatprep.subr.mxu1 %v4648_v15 }
 0x29e   :  { %3185 = vmatpush3.msra.mxu0 %v4655_v27  ;;  %3220 = vmatpush3.msra.mxu1 %v4660_v20 }
 0x29f   :  { %3186 = vmatprep.subr.mxu0 %v4667_v21  ;;  %3221 = vmatprep.subr.mxu1 %v4672_v22 }
 0x2a0   :  { %3187 = vmatpush3.msra.mxu0 %v4679_v23  ;;  %3222 = vmatpush3.msra.mxu1 %v4684_v24 }
 0x2a1   :  { %3188 = vmatprep.subr.mxu0 %v4691_v25  ;;  %3223 = vmatprep.subr.mxu1 %v4696_v29 }
 0x2a2   :  { %3189 = vmatpush3.msra.mxu0 %v4707_v34  ;;  %3224 = vmatpush3.msra.mxu1 %v4712_v35 }
 0x2a3   :  { %3190 = vmatprep.subr.mxu0 %v4719_v36  ;;  %3225 = vmatprep.subr.mxu1 %v4724_v37 }
 0x2a4   :  { %3191 = vmatpush3.msra.mxu0 %v4733_v39  ;;  %3226 = vmatpush3.msra.mxu1 %v4738_v40 }
 0x2a5   :  { %3192 = vmatprep.subr.mxu0 %v4751_v44  ;;  %3227 = vmatprep.subr.mxu1 %v5327_v33 }
 0x2a6   :  { %3193 = vmatpush3.msra.mxu0 %v5328_v38  ;;  %3228 = vmatpush3.msra.mxu1 %v5329_v49 }
 0x2a7   :  { %3194 = vmatprep.subr.mxu0 %v5330_v16  ;;  %3229 = vmatprep.subr.mxu1 %v5332_v26 }
 0x2a8   :  { %3195 = vmatpush3.msra.mxu0 %v5333_v28  ;;  %3230 = vmatpush3.msra.mxu1 %v5335_v53 }
 0x2a9   :  { %3196 = vmatprep.subr.mxu0 %v5336_v59  ;;  %3231 = vmatprep.subr.mxu1 %v5338_v47 }
 0x2aa   :  { %3197 = vmatpush3.msra.mxu0 %v5339_v48  ;;  %3232 = vmatpush3.msra.mxu1 %v5341_v42 }
 0x2ab   :  { %3198 = vmatprep.subr.mxu0 %v5342_v46  ;;  %3233 = vmatprep.subr.mxu1 %v5361_v54 }
 0x2ac   :  { %3199 = vmatpush3.msra.mxu0 %v5362_v18  ;;  %3234 = vmatpush3.msra.mxu1 %v5363_v19 }
 0x2ad   :  { %3200 = vmatprep.subr.mxu0 %v5364_v51  ;;  %3235 = vmatprep.subr.mxu1 %v5365_v31  ;;  %v5381_v31 = vld [vmem:[#allocation39_spill] sm:$0xff] }
 0x2ae   :  { %3201 = vmatpush3.msra.mxu0 %v5366_v57  ;;  %3236 = vmatpush3.msra.mxu1 %v5367_v50  ;;  %v5380_v57 = vld [vmem:[#allocation38_spill] sm:$0xff] }
 0x2af   :  { %3202 = vmatprep.subr.mxu0 %v5368_v32  ;;  %3237 = vmatprep.subr.mxu1 %v5369_v58 }
 0x2b0   :  { %3203 = vmatpush3.msra.mxu0 %v5370_v41  ;;  %3238 = vmatpush3.msra.mxu1 %v5371_v52  ;;  %v1817_v52 = vld [vmem:[%s5222_s3 + $0x20] sm:$0xff]  ;;  %v5379_v41 = vld [vmem:[#allocation37_spill] sm:$0xff] }
 0x2b1   :  { %3204 = vmatprep.subr.mxu0 %v5372_v56  ;;  %3239 = vmatprep.subr.mxu1 %v5373_v30  ;;  %v1818_v30 = vld [vmem:[%s5222_s3 + $0x28] sm:$0xff]  ;;  %vm1825_vm6 = vcmp.ge.f32.partialorder %v1817_v52, 0.1 }
 0x2b2   :  { %3205 = vmatpush3.msra.mxu0 %v5374_v17  ;;  %3240 = vmatpush3.msra.mxu1 %v5375_v55  ;;  %v5378_v56 = vld [vmem:[#allocation36_spill] sm:$0xff]  ;;  %vm1826_vm7 = vcmp.ge.f32.partialorder %v1818_v30, 0.1 }
 0x2b3   :  { %3244 = vmatprep.subr.mxu0 %v5376_v45  ;;  %3279 = vmatprep.subr.mxu1 %v5377_v43 }
 0x2ba   :  { %v1791_v50 = vpop.xlane.xlu0 %1790 }
 0x2bb   :  { %3353 = vrcp.f32 %v1791_v50 }
 0x2c8   :  { %v3354_v32 = vpop.eup %3353 }
 0x2c9   :  { %v1811_v58 = vmul.f32 1.1111112, %v3354_v32 }
 0x2cb   :  { %v1837_v17 = vmul.f32 %v5378_v56, %v1811_v58  ;;  %v1838_v55 = vmul.f32 %v5379_v41, %v1811_v58  ;;  %v1839_v45 = vmul.f32 %v5380_v57, %v1811_v58  ;;  %v1840_v43 = vmul.f32 %v5381_v31, %v1811_v58 }
 0x2cd   :  { %v1865_v50 = vcombine.low %v1837_v17, %v1838_v55  ;;  %v1866_v32 = vcombine.low %v1839_v45, %v1840_v43 }
 0x2cf   :  { %v1881_v51 = vsel %vm1825_vm6, %v1865_v50, 0.0  ;;  %v1882_v19 = vsel %vm1826_vm7, %v1866_v32, 0.0 }
 0x2d0   :  { %v2179_v18 = vcombine.high %v1881_v51, %v1881_v51  ;;  %v2180_v54 = vcombine.high %v1882_v19, %v1882_v19 }
 0x2d2   :  { %2247 = vmatprep.mubr.f32.mxu0 %v2179_v18  ;;  %2317 = vmatprep.mubr.f32.mxu1 %v2180_v54 }
 0x2d3   :  { %2758 = vmatmul.mubr.msk.f32.vlgmr.msra.gmra.mxu0 %vm1825_vm6, %v1865_v50  ;;  %2759 = vmatmul.mubr.msk.f32.vlgmr.msra.gmra.mxu1 %vm1826_vm7, %v1866_v32 }
 0x2d4   :  { %3245 = vmatpush3.msra.mxu0 %v4533_v60  ;;  %3280 = vmatpush3.msra.mxu1 %v4540_v61  ;;  %v5382_v60 = vld [vmem:[#allocation19_spill] sm:$0xff]  ;;  %v5383_v61 = vld [vmem:[#allocation20_spill] sm:$0xff] }
 0x2d5   :  { %3246 = vmatprep.subr.mxu0 %v4545_v62  ;;  %3281 = vmatprep.subr.mxu1 %v4550_v63  ;;  %v5384_v62 = vld [vmem:[#allocation21_spill] sm:$0xff]  ;;  %v5385_v63 = vld [vmem:[#allocation22_spill] sm:$0xff] }
 0x2d6   :  { %3247 = vmatpush3.msra.mxu0 %v4557_v0  ;;  %3282 = vmatpush3.msra.mxu1 %v4562_v1  ;;  %v5386_v0 = vld [vmem:[#allocation23_spill] sm:$0xff]  ;;  %v5387_v1 = vld [vmem:[#allocation24_spill] sm:$0xff] }
 0x2d7   :  { %3248 = vmatprep.subr.mxu0 %v4567_v2  ;;  %3283 = vmatprep.subr.mxu1 %v4574_v3  ;;  %v5388_v2 = vld [vmem:[#allocation25_spill] sm:$0xff]  ;;  %v5389_v3 = vld [vmem:[#allocation26_spill] sm:$0xff] }
 0x2d8   :  { %3249 = vmatpush3.msra.mxu0 %v4579_v4  ;;  %3284 = vmatpush3.msra.mxu1 %v4584_v5  ;;  %v5390_v4 = vld [vmem:[#allocation27_spill] sm:$0xff]  ;;  %v5391_v5 = vld [vmem:[#allocation28_spill] sm:$0xff] }
 0x2d9   :  { %3250 = vmatprep.subr.mxu0 %v4591_v6  ;;  %3285 = vmatprep.subr.mxu1 %v4596_v7  ;;  %v5392_v6 = vld [vmem:[#allocation29_spill] sm:$0xff]  ;;  %v5393_v7 = vld [vmem:[#allocation30_spill] sm:$0xff] }
 0x2da   :  { %3251 = vmatpush3.msra.mxu0 %v4603_v8  ;;  %3286 = vmatpush3.msra.mxu1 %v4608_v9  ;;  %v5394_v8 = vld [vmem:[#allocation31_spill] sm:$0xff]  ;;  %v5395_v9 = vld [vmem:[#allocation32_spill] sm:$0xff] }
 0x2db   :  { %3252 = vmatprep.subr.mxu0 %v4619_v10  ;;  %3287 = vmatprep.subr.mxu1 %v4624_v11  ;;  %v5396_v10 = vld [vmem:[#allocation33_spill] sm:$0xff] }
 0x2dc   :  { %3253 = vmatpush3.msra.mxu0 %v4631_v12  ;;  %3288 = vmatpush3.msra.mxu1 %v4636_v13 }
 0x2dd   :  { %3254 = vmatprep.subr.mxu0 %v4643_v14  ;;  %3289 = vmatprep.subr.mxu1 %v4648_v15  ;;  %v1819_v14 = vld [vmem:[%s5222_s3 + $0x30] sm:$0xff]  ;;  %v1820_v15 = vld [vmem:[%s5222_s3 + $0x38] sm:$0xff]  ;;  %s3379_s3 = smov [#allocation2]  }
 0x2de   :  { %3255 = vmatpush3.msra.mxu0 %v4655_v27  ;;  %3290 = vmatpush3.msra.mxu1 %v4660_v20  ;;  %v5397_v27 = vld [vmem:[#allocation7_spill] sm:$0xff]  ;;  %vm1827_vm8 = vcmp.ge.f32.partialorder %v1819_v14, 0.1  ;;  %vm1828_vm9 = vcmp.ge.f32.partialorder %v1820_v15, 0.1  ;;  %s2479_s20 = sshll.u32 %s3379_s3, 4  ;;  %s2480_s20 = int_to_ptr.vmem [resolvable:$true] %s2479_s20 }
 0x2df   :  { %3256 = vmatprep.subr.mxu0 %v4667_v21  ;;  %3291 = vmatprep.subr.mxu1 %v4672_v22  ;;  %v5398_v21 = vld [vmem:[#allocation8_spill] sm:$0xff]  ;;  %s3357_s21 = scalar_lea.vmem %s2480_s20, 256  ;;  %p3362_p1 = scmp.lt.s32.totalorder %s2480_s20, %s2480_s20 }
 0x2e0   :  { %3257 = vmatpush3.msra.mxu0 %v4679_v23  ;;  %3292 = vmatpush3.msra.mxu1 %v4684_v24  ;;  %v5399_v23 = vld [vmem:[#allocation9_spill] sm:$0xff]  ;;  %p3358_p0 = scmp.ne.s32.totalorder %s2480_s20, %s3357_s21  ;;  %p3363_p2 = scmp.lt.s32.totalorder %s3357_s21, %s3357_s21 }
 0x2e1   :  { %3258 = vmatprep.subr.mxu0 %v4691_v25  ;;  %3293 = vmatprep.subr.mxu1 %v4696_v29  ;;  %v5400_v25 = vld [vmem:[#allocation10_spill] sm:$0xff] }
 0x2e2   :  { %3259 = vmatpush3.msra.mxu0 %v4707_v34  ;;  %3294 = vmatpush3.msra.mxu1 %v4712_v35  ;;  %p3364_p3 = por %p3363_p2, %p3362_p1 }
 0x2e3   :  { %3260 = vmatprep.subr.mxu0 %v4719_v36  ;;  %3295 = vmatprep.subr.mxu1 %v4724_v37 }
 0x2e4   :  { %3261 = vmatpush3.msra.mxu0 %v4733_v39  ;;  %3296 = vmatpush3.msra.mxu1 %v4738_v40  ;;  %p3365_p4 = pnand %p3364_p3, %p3358_p0 }
 0x2e5   :  { %3262 = vmatprep.subr.mxu0 %v4751_v44  ;;  %3297 = vmatprep.subr.mxu1 %v5327_v33 }
 0x2e6   :  { %3263 = vmatpush3.msra.mxu0 %v5328_v38  ;;  %3298 = vmatpush3.msra.mxu1 %v5329_v49 }
 0x2e7   :  { %3264 = vmatprep.subr.mxu0 %v5330_v16  ;;  %3299 = vmatprep.subr.mxu1 %v5332_v26 }
 0x2e8   :  { %3265 = vmatpush3.msra.mxu0 %v5333_v28  ;;  %3300 = vmatpush3.msra.mxu1 %v5335_v53 }
 0x2e9   :  { %3266 = vmatprep.subr.mxu0 %v5336_v59  ;;  %3301 = vmatprep.subr.mxu1 %v5338_v47 }
 0x2ea   :  { %3267 = vmatpush3.msra.mxu0 %v5339_v48  ;;  %3302 = vmatpush3.msra.mxu1 %v5341_v42 }
 0x2eb   :  { %3268 = vmatprep.subr.mxu0 %v5342_v46  ;;  %3303 = vmatprep.subr.mxu1 %v5382_v60 }
 0x2ec   :  { %3269 = vmatpush3.msra.mxu0 %v5383_v61  ;;  %3304 = vmatpush3.msra.mxu1 %v5384_v62 }
 0x2ed   :  { %3270 = vmatprep.subr.mxu0 %v5385_v63  ;;  %3305 = vmatprep.subr.mxu1 %v5386_v0 }
 0x2ee   :  { %3271 = vmatpush3.msra.mxu0 %v5387_v1  ;;  %3306 = vmatpush3.msra.mxu1 %v5388_v2 }
 0x2ef   :  { %3272 = vmatprep.subr.mxu0 %v5389_v3  ;;  %3307 = vmatprep.subr.mxu1 %v5390_v4 }
 0x2f0   :  { %3273 = vmatpush3.msra.mxu0 %v5391_v5  ;;  %3308 = vmatpush3.msra.mxu1 %v5392_v6 }
 0x2f1   :  { %3274 = vmatprep.subr.mxu0 %v5393_v7  ;;  %3309 = vmatprep.subr.mxu1 %v5394_v8 }
 0x2f2   :  { %3275 = vmatpush3.msra.mxu0 %v5395_v9  ;;  %3310 = vmatpush3.msra.mxu1 %v5396_v10 }
 0x2fa   :  { %v1800_v11 = vpop.xlane.xlu1 %1799 }
 0x2fb   :  { %3355 = vrcp.f32 %v1800_v11 }
 0x308   :  { %v3356_v12 = vpop.eup %3355 }
 0x309   :  { %v1812_v13 = vmul.f32 1.1111112, %v3356_v12 }
 0x30b   :  { %v1841_v20 = vmul.f32 %v5397_v27, %v1812_v13  ;;  %v1842_v22 = vmul.f32 %v5398_v21, %v1812_v13  ;;  %v1843_v24 = vmul.f32 %v5399_v23, %v1812_v13  ;;  %v1844_v29 = vmul.f32 %v5400_v25, %v1812_v13 }
 0x30d   :  { %v1867_v34 = vcombine.low %v1841_v20, %v1842_v22  ;;  %v1868_v35 = vcombine.low %v1843_v24, %v1844_v29 }
 0x30f   :  { %v1883_v36 = vsel %vm1827_vm8, %v1867_v34, 0.0  ;;  %v1884_v37 = vsel %vm1828_vm9, %v1868_v35, 0.0 }
 0x310   :  { %v2325_v39 = vcombine.high %v1883_v36, %v1883_v36  ;;  %v2326_v40 = vcombine.high %v1884_v37, %v1884_v37 }
 0x312   :  { %2393 = vmatprep.mubr.f32.mxu0 %v2325_v39  ;;  %2463 = vmatprep.mubr.f32.mxu1 %v2326_v40 }
 0x313   :  { %v3066_v44 = vpop.f32.mrf.mxu0  ;;  %v3101_v33 = vpop.f32.mrf.mxu1  ;;  %2760 = vmatmul.mubr.msk.f32.vlgmr.msra.gmra.mxu0 %vm1827_vm8, %v1867_v34  ;;  %2761 = vmatmul.mubr.msk.f32.vlgmr.msra.gmra.mxu1 %vm1828_vm9, %v1868_v35 }
 0x315   :  { %v3067_v38 = vpop.f32.mrf.mxu0  ;;  %v3102_v49 = vpop.f32.mrf.mxu1 }
 0x316   :  { %v3068_v16 = vadd.f32 %v3067_v38, %v3066_v44  ;;  %v3103_v26 = vadd.f32 %v3102_v49, %v3101_v33 }
 0x318   :  { %v2028_v28 = vadd.f32 %v3103_v26, %v3068_v16 }
 0x31a   :  { %2470 = vst.msk [vmem:[#allocation2] sm:$0xf] %vm2469_vm10, %v2028_v28 }
 0x353   :  { %v3136_v53 = vpop.f32.mrf.mxu0  ;;  %v3171_v59 = vpop.f32.mrf.mxu1 }
 0x355   :  { %v3137_v47 = vpop.f32.mrf.mxu0  ;;  %v3172_v48 = vpop.f32.mrf.mxu1 }
 0x356   :  { %v3138_v42 = vadd.f32 %v3137_v47, %v3136_v53  ;;  %v3173_v46 = vadd.f32 %v3172_v48, %v3171_v59 }
 0x358   :  { %v2174_v54 = vadd.f32 %v3173_v46, %v3138_v42 }
 0x35a   :  { %2471 = vst.msk [vmem:[#allocation2 + $0x4] sm:$0xf] %vm2469_vm10, %v2174_v54 }
 0x393   :  { %v3206_v18 = vpop.f32.mrf.mxu0  ;;  %v3241_v19 = vpop.f32.mrf.mxu1 }
 0x395   :  { %v3207_v51 = vpop.f32.mrf.mxu0  ;;  %v3242_v31 = vpop.f32.mrf.mxu1 }
 0x396   :  { %v3208_v57 = vadd.f32 %v3207_v51, %v3206_v18  ;;  %v3243_v58 = vadd.f32 %v3242_v31, %v3241_v19 }
 0x398   :  { %v2320_v41 = vadd.f32 %v3243_v58, %v3208_v57 }
 0x39a   :  { %2472 = vst.msk [vmem:[#allocation2 + $0x8] sm:$0xf] %vm2469_vm10, %v2320_v41 }
 0x3d3   :  { %v3276_v52 = vpop.f32.mrf.mxu0  ;;  %v3311_v56 = vpop.f32.mrf.mxu1 }
 0x3d5   :  { %v3277_v30 = vpop.f32.mrf.mxu0  ;;  %v3312_v17 = vpop.f32.mrf.mxu1 }
 0x3d6   :  { %v3278_v55 = vadd.f32 %v3277_v30, %v3276_v52  ;;  %v3313_v45 = vadd.f32 %v3312_v17, %v3311_v56 }
 0x3d8   :  { %v2466_v43 = vadd.f32 %v3313_v45, %v3278_v55 }
 0x3da   :  { %2473 = vst.msk [vmem:[#allocation2 + $0xc] sm:$0xf] %vm2469_vm10, %v2466_v43 }
 0x3db   :  { %3368 = shalt.err (!%p3365_p4)
}
 0x3dc   :  { %s3380_s0 = smov 64   ;;  %s3381_s22 = smov 4  }
 0x3dd   :  { %2485 = dma.vmem_to_hbm [thread:$0]  %s2480_s20, 256, %s5223_s4, [#allocation3], %s3380_s0, %s3380_s0, %s3381_s22  }
 0x3de   :  { %3377 = dma.done.wait [#allocation3], 256  }
 0x3df   :  { %3378 = vsyncadd [#allocation3], 4294967040 }
 0x3e0   :  { %2489 = vsyncpa [#allocation3], 1 }

</bundles_post_ra>
